<compile_context>
chip_gen: v7x
topology: tpu7x:2x2x1
jax: 0.10.0
libtpu: 0.0.40
codegen_flags: <defaults>
</compile_context>

<pallas_src>
import jax
import jax.numpy as jnp
from jax.experimental import pallas as pl
from jax.experimental.pallas import tpu as pltpu

CONF_HIDDEN = 32  # fixed by the PyTorch module (Linear(input_dim, 32))


# ----------------------------- fused kernel ----------------------------------

def _fused_kernel(x_ref, ww1_ref, wb1_ref, ww2_ref, wb2_ref,
                  w1_ref, b1_ref, w2_ref, b2_ref,
                  cw1_ref, cb1_ref, cw2_ref, cb2_ref,
                  out_ref, weights_ref, conf_ref):
    x = x_ref[...]                                   # (B, D)
    B, D = x.shape
    S = w1_ref.shape[0]
    K = conf_ref.shape[1]

    # ---- weight network + softmax -------------------------------------------
    h = jnp.maximum(
        jnp.dot(x, ww1_ref[...], preferred_element_type=jnp.float32)
        + wb1_ref[...], 0.0)                                       # (B, H)
    logits = (jnp.dot(h, ww2_ref[...], preferred_element_type=jnp.float32)
              + wb2_ref[...])                                      # (B, S)
    m = jnp.max(logits, axis=-1, keepdims=True)
    e = jnp.exp(logits - m)
    w = e / jnp.sum(e, axis=-1, keepdims=True)                     # (B, S)
    weights_ref[...] = w

    # ---- dense per-source expert + confidence (static unroll over S) --------
    iota_s = jax.lax.broadcasted_iota(jnp.int32, (B, S), 1)
    conf_all = jnp.zeros((B, S), jnp.float32)
    outs = []
    for s in range(S):
        hs = jnp.maximum(
            jnp.dot(x, w1_ref[s], preferred_element_type=jnp.float32)
            + b1_ref[s], 0.0)                                      # (B, H)
        o_s = (jnp.dot(hs, w2_ref[s], preferred_element_type=jnp.float32)
               + b2_ref[s])                                        # (B, D)
        ch = jnp.maximum(
            jnp.dot(o_s, cw1_ref[s], preferred_element_type=jnp.float32)
            + cb1_ref[s], 0.0)                                     # (B, 32)
        z = (jnp.dot(ch, cw2_ref[s], preferred_element_type=jnp.float32)
             + cb2_ref[s])                                         # (B, 1)
        c_s = 1.0 / (1.0 + jnp.exp(-z))                            # (B, 1)
        outs.append(o_s)
        conf_all = conf_all + jnp.where(iota_s == s, c_s, 0.0)     # (B, S)

    # ---- in-kernel top-k (iterative argmax over the lane-resident (B,S)) ----
    iota_k = jax.lax.broadcasted_iota(jnp.int32, (B, K), 1)
    work = w
    topk_mask = jnp.zeros((B, S), jnp.float32)
    conf_topk = jnp.zeros((B, K), jnp.float32)
    for k in range(K):
        mk = jnp.max(work, axis=-1, keepdims=True)                 # (B, 1)
        is_max = work == mk
        # tie-break toward the lowest index (matches torch.topk / lax.top_k)
        first = jnp.min(jnp.where(is_max, iota_s, S), axis=-1, keepdims=True)
        onehot = (iota_s == first).astype(jnp.float32)             # (B, S)
        topk_mask = topk_mask + onehot
        ck = jnp.sum(onehot * conf_all, axis=-1, keepdims=True)    # (B, 1)
        conf_topk = conf_topk + jnp.where(iota_k == k, ck, 0.0)
        work = jnp.where(onehot > 0, -1.0, work)   # weights > 0, so -1 masks
    conf_ref[...] = conf_topk

    # ---- confidence-weighted combine -----------------------------------------
    cw = w * conf_all * topk_mask                                  # (B, S)
    denom = jnp.sum(cw, axis=-1, keepdims=True) + 1e-6             # (B, 1)
    norm = cw / denom                                              # (B, S)
    acc = jnp.zeros((B, D), jnp.float32)
    for s in range(S):
        acc = acc + norm[:, s:s + 1] * outs[s]
    out_ref[...] = acc


# ----------------------------- wrapper ----------------------------------------

def _full_spec(a):
    nd = a.ndim
    return pl.BlockSpec(a.shape, lambda i, _nd=nd: (0,) * _nd)


def large_scale_source_integration(x, params, sparse_topk):
    B, D = x.shape
    S, _, H = params["w1"].shape
    K = sparse_topk

    args = (x,
            params["ww1"], params["wb1"], params["ww2"], params["wb2"],
            params["w1"], params["b1"], params["w2"], params["b2"],
            params["cw1"], params["cb1"], params["cw2"], params["cb2"])

    out, weights, conf = pl.pallas_call(
        _fused_kernel,
        grid=(1,),
        in_specs=[_full_spec(a) for a in args],
        out_specs=[
            pl.BlockSpec((B, D), lambda i: (0, 0)),
            pl.BlockSpec((B, S), lambda i: (0, 0)),
            pl.BlockSpec((B, K), lambda i: (0, 0)),
        ],
        out_shape=(
            jax.ShapeDtypeStruct((B, D), jnp.float32),
            jax.ShapeDtypeStruct((B, S), jnp.float32),
            jax.ShapeDtypeStruct((B, K), jnp.float32),
        ),
        compiler_params=pltpu.CompilerParams(
            dimension_semantics=("arbitrary",)),
    )(*args)

    sparsity = (weights > 0.01).astype(jnp.float32).mean()
    aux = {
        "weights": weights,        # (B, n_sources)
        "confidences": conf,       # (B, K)  == squeeze(-1) of torch version
        "sparsity": sparsity,      # scalar
    }
    return out, aux


# ----------------------------- pure-JAX reference ----------------------------

def reference(x, params, K):
    h = jnp.maximum(x @ params["ww1"] + params["wb1"], 0.0)
    logits = h @ params["ww2"] + params["wb2"]
    weights = jax.nn.softmax(logits, axis=-1)
    topk_values, topk_indices = jax.lax.top_k(weights, K)

    def one(xb, idx):
        hh = jnp.maximum(xb @ params["w1"][idx] + params["b1"][idx, 0], 0.0)
        out = hh @ params["w2"][idx] + params["b2"][idx, 0]
        ch = jnp.maximum(out @ params["cw1"][idx] + params["cb1"][idx, 0], 0.0)
        c = jax.nn.sigmoid(ch @ params["cw2"][idx] + params["cb2"][idx, 0])
        return out, c[0]

    outs, confs = jax.vmap(
        lambda xb, idxs: jax.vmap(lambda i: one(xb, i))(idxs))(x, topk_indices)
    cw = topk_values[..., None] * confs[..., None]
    cw = cw / (cw.sum(axis=1, keepdims=True) + 1e-6)
    out = (outs * cw).sum(axis=1)
    return out, {"weights": weights, "confidences": confs,
                 "sparsity": (weights > 0.01).astype(jnp.float32).mean()}


# ----------------------------- main ------------------------------------------

if __name__ == "__main__":
    B, D, H, S, K = 4, 32, 64, 8, 4  # batch, input_dim, hidden_dim, n_sources, sparse_topk

    key = jax.random.PRNGKey(0)
    keys = jax.random.split(key, 16)

    def lin(k, fan_in, shape):
        return jax.random.normal(k, shape, jnp.float32) / jnp.sqrt(float(fan_in))

    params = {
        # weight_network: Linear(D,H) -> ReLU -> Linear(H,S)
        "ww1": lin(keys[0], D, (D, H)),
        "wb1": lin(keys[1], D, (1, H)),
        "ww2": lin(keys[2], H, (H, S)),
        "wb2": lin(keys[3], H, (1, S)),
        # source_transforms (stacked): Linear(D,H) -> ReLU -> Linear(H,D)
        "w1": lin(keys[4], D, (S, D, H)),
        "b1": lin(keys[5], D, (S, 1, H)),
        "w2": lin(keys[6], H, (S, H, D)),
        "b2": lin(keys[7], H, (S, 1, D)),
        # confidence_nets (stacked): Linear(D,32) -> ReLU -> Linear(32,1) -> Sigmoid
        "cw1": lin(keys[8], D, (S, D, CONF_HIDDEN)),
        "cb1": lin(keys[9], D, (S, 1, CONF_HIDDEN)),
        "cw2": lin(keys[10], CONF_HIDDEN, (S, CONF_HIDDEN, 1)),
        "cb2": lin(keys[11], CONF_HIDDEN, (S, 1, 1)),
    }
    x = jax.random.normal(keys[12], (B, D), jnp.float32)

    out, aux = large_scale_source_integration(x, params, K)
    jax.block_until_ready(out)

    ref_out, ref_aux = reference(x, params, K)
    assert out.shape == (B, D)
    assert aux["weights"].shape == (B, S)
    assert aux["confidences"].shape == (B, K)
    assert jnp.allclose(out, ref_out, atol=1e-2, rtol=1e-2), \
        f"max abs diff {jnp.max(jnp.abs(out - ref_out))}"
    assert jnp.allclose(aux["confidences"], ref_aux["confidences"], atol=1e-2, rtol=1e-2)
    assert jnp.allclose(aux["weights"], ref_aux["weights"], atol=1e-2, rtol=1e-2)
    assert jnp.allclose(aux["sparsity"], ref_aux["sparsity"], atol=1e-3)

    print("KERNEL_OK")
</pallas_src>

<mosaic_0001>
module attributes {stable_mosaic.version = 11 : i64} {
  func.func @_fused_kernel(%arg0: i32, %arg1: memref<4x32xf32, #tpu.memory_space<vmem>>, %arg2: memref<32x64xf32, #tpu.memory_space<vmem>>, %arg3: memref<1x64xf32, #tpu.memory_space<vmem>>, %arg4: memref<64x8xf32, #tpu.memory_space<vmem>>, %arg5: memref<1x8xf32, #tpu.memory_space<vmem>>, %arg6: memref<8x32x64xf32, #tpu.memory_space<vmem>>, %arg7: memref<8x1x64xf32, #tpu.memory_space<vmem>>, %arg8: memref<8x64x32xf32, #tpu.memory_space<vmem>>, %arg9: memref<8x1x32xf32, #tpu.memory_space<vmem>>, %arg10: memref<8x32x32xf32, #tpu.memory_space<vmem>>, %arg11: memref<8x1x32xf32, #tpu.memory_space<vmem>>, %arg12: memref<8x32x1xf32, #tpu.memory_space<vmem>>, %arg13: memref<8x1x1xf32, #tpu.memory_space<vmem>>, %arg14: memref<4x32xf32, #tpu.memory_space<vmem>>, %arg15: memref<4x8xf32, #tpu.memory_space<vmem>>, %arg16: memref<4x4xf32, #tpu.memory_space<vmem>>) attributes {dimension_semantics = [#tpu.dimension_semantics<arbitrary>], iteration_bounds = array<i64: 1>, scalar_prefetch = 0 : i64, scratch_operands = 0 : i64, tpu.core_type = #tpu.core_type<tc>, window_params = [{pipeline_mode = #tpu.pipeline_mode<synchronous>, transform_indices = @transform_0, window_bounds = array<i64: 4, 32>}, {pipeline_mode = #tpu.pipeline_mode<synchronous>, transform_indices = @transform_1, window_bounds = array<i64: 32, 64>}, {pipeline_mode = #tpu.pipeline_mode<synchronous>, transform_indices = @transform_2, window_bounds = array<i64: 1, 64>}, {pipeline_mode = #tpu.pipeline_mode<synchronous>, transform_indices = @transform_3, window_bounds = array<i64: 64, 8>}, {pipeline_mode = #tpu.pipeline_mode<synchronous>, transform_indices = @transform_4, window_bounds = array<i64: 1, 8>}, {pipeline_mode = #tpu.pipeline_mode<synchronous>, transform_indices = @transform_5, window_bounds = array<i64: 8, 32, 64>}, {pipeline_mode = #tpu.pipeline_mode<synchronous>, transform_indices = @transform_6, window_bounds = array<i64: 8, 1, 64>}, {pipeline_mode = #tpu.pipeline_mode<synchronous>, transform_indices = @transform_7, window_bounds = array<i64: 8, 64, 32>}, {pipeline_mode = #tpu.pipeline_mode<synchronous>, transform_indices = @transform_8, window_bounds = array<i64: 8, 1, 32>}, {pipeline_mode = #tpu.pipeline_mode<synchronous>, transform_indices = @transform_9, window_bounds = array<i64: 8, 32, 32>}, {pipeline_mode = #tpu.pipeline_mode<synchronous>, transform_indices = @transform_10, window_bounds = array<i64: 8, 1, 32>}, {pipeline_mode = #tpu.pipeline_mode<synchronous>, transform_indices = @transform_11, window_bounds = array<i64: 8, 32, 1>}, {pipeline_mode = #tpu.pipeline_mode<synchronous>, transform_indices = @transform_12, window_bounds = array<i64: 8, 1, 1>}, {pipeline_mode = #tpu.pipeline_mode<synchronous>, transform_indices = @transform_13, window_bounds = array<i64: 4, 32>}, {pipeline_mode = #tpu.pipeline_mode<synchronous>, transform_indices = @transform_14, window_bounds = array<i64: 4, 8>}, {pipeline_mode = #tpu.pipeline_mode<synchronous>, transform_indices = @transform_15, window_bounds = array<i64: 4, 4>}]} {
    %c0 = arith.constant 0 : index
    %c0_0 = arith.constant 0 : index
    %0 = vector.load %arg1[%c0, %c0_0] : memref<4x32xf32, #tpu.memory_space<vmem>>, vector<4x32xf32>
    %c0_1 = arith.constant 0 : index
    %c0_2 = arith.constant 0 : index
    %1 = vector.load %arg2[%c0_1, %c0_2] : memref<32x64xf32, #tpu.memory_space<vmem>>, vector<32x64xf32>
    %cst = arith.constant dense<0.000000e+00> : vector<4x64xf32>
    %2 = tpu.matmul %0, %1, %cst {dimension_numbers = #tpu.dot_dimension_numbers<[1], [0], [0], [1], [0, 0, 1, 1], [], []>} : vector<4x32xf32>, vector<32x64xf32>, vector<4x64xf32> -> vector<4x64xf32>
    %c0_3 = arith.constant 0 : index
    %c0_4 = arith.constant 0 : index
    %3 = vector.load %arg3[%c0_3, %c0_4] : memref<1x64xf32, #tpu.memory_space<vmem>>, vector<1x64xf32>
    %4 = vector.broadcast %3 : vector<1x64xf32> to vector<4x64xf32>
    %5 = arith.addf %2, %4 : vector<4x64xf32>
    %cst_5 = arith.constant 0.000000e+00 : f32
    %6 = vector.broadcast %cst_5 : f32 to vector<4x64xf32>
    %7 = arith.maximumf %5, %6 : vector<4x64xf32>
    %c0_6 = arith.constant 0 : index
    %c0_7 = arith.constant 0 : index
    %8 = vector.load %arg4[%c0_6, %c0_7] : memref<64x8xf32, #tpu.memory_space<vmem>>, vector<64x8xf32>
    %cst_8 = arith.constant dense<0.000000e+00> : vector<4x8xf32>
    %9 = tpu.matmul %7, %8, %cst_8 {dimension_numbers = #tpu.dot_dimension_numbers<[1], [0], [0], [1], [0, 0, 1, 1], [], []>} : vector<4x64xf32>, vector<64x8xf32>, vector<4x8xf32> -> vector<4x8xf32>
    %c0_9 = arith.constant 0 : index
    %c0_10 = arith.constant 0 : index
    %10 = vector.load %arg5[%c0_9, %c0_10] : memref<1x8xf32, #tpu.memory_space<vmem>>, vector<1x8xf32>
    %11 = vector.broadcast %10 : vector<1x8xf32> to vector<4x8xf32>
    %12 = arith.addf %9, %11 : vector<4x8xf32>
    %cst_11 = arith.constant dense<0xFF800000> : vector<4xf32>
    %13 = vector.multi_reduction <maximumf>, %12, %cst_11 [1] : vector<4x8xf32> to vector<4xf32>
    %14 = vector.shape_cast %13 : vector<4xf32> to vector<4x1xf32>
    %15 = vector.broadcast %14 : vector<4x1xf32> to vector<4x8xf32>
    %16 = arith.subf %12, %15 : vector<4x8xf32>
    %17 = math.exp %16 : vector<4x8xf32>
    %cst_12 = arith.constant dense<0.000000e+00> : vector<4xf32>
    %18 = vector.multi_reduction <add>, %17, %cst_12 [1] : vector<4x8xf32> to vector<4xf32>
    %19 = vector.shape_cast %18 : vector<4xf32> to vector<4x1xf32>
    %20 = vector.broadcast %19 : vector<4x1xf32> to vector<4x8xf32>
    %21 = arith.divf %17, %20 : vector<4x8xf32>
    %c0_13 = arith.constant 0 : index
    %c0_14 = arith.constant 0 : index
    %22 = vector.load %arg15[%c0_13, %c0_14] : memref<4x8xf32, #tpu.memory_space<vmem>>, vector<4x8xf32>
    tpu.vector_store %arg15[%c0_13, %c0_14], %21 {strides = array<i32>} : memref<4x8xf32, #tpu.memory_space<vmem>>, vector<4x8xf32>,
    %23 = tpu.iota {dimensions = array<i32: 1>} : vector<4x8xi32>
    %cst_15 = arith.constant 0.000000e+00 : f32
    %24 = vector.broadcast %cst_15 : f32 to vector<4x8xf32>
    %c0_16 = arith.constant 0 : index
    %c0_17 = arith.constant 0 : index
    %c0_18 = arith.constant 0 : index
    %25 = vector.load %arg6[%c0_16, %c0_17, %c0_18] : memref<8x32x64xf32, #tpu.memory_space<vmem>>, vector<1x32x64xf32>
    %26 = vector.shape_cast %25 : vector<1x32x64xf32> to vector<32x64xf32>
    %cst_19 = arith.constant dense<0.000000e+00> : vector<4x64xf32>
    %27 = tpu.matmul %0, %26, %cst_19 {dimension_numbers = #tpu.dot_dimension_numbers<[1], [0], [0], [1], [0, 0, 1, 1], [], []>} : vector<4x32xf32>, vector<32x64xf32>, vector<4x64xf32> -> vector<4x64xf32>
    %c0_20 = arith.constant 0 : index
    %c0_21 = arith.constant 0 : index
    %c0_22 = arith.constant 0 : index
    %28 = vector.load %arg7[%c0_20, %c0_21, %c0_22] : memref<8x1x64xf32, #tpu.memory_space<vmem>>, vector<1x1x64xf32>
    %29 = vector.shape_cast %28 : vector<1x1x64xf32> to vector<1x64xf32>
    %30 = vector.broadcast %29 : vector<1x64xf32> to vector<4x64xf32>
    %31 = arith.addf %27, %30 : vector<4x64xf32>
    %cst_23 = arith.constant 0.000000e+00 : f32
    %32 = vector.broadcast %cst_23 : f32 to vector<4x64xf32>
    %33 = arith.maximumf %31, %32 : vector<4x64xf32>
    %c0_24 = arith.constant 0 : index
    %c0_25 = arith.constant 0 : index
    %c0_26 = arith.constant 0 : index
    %34 = vector.load %arg8[%c0_24, %c0_25, %c0_26] : memref<8x64x32xf32, #tpu.memory_space<vmem>>, vector<1x64x32xf32>
    %35 = vector.shape_cast %34 : vector<1x64x32xf32> to vector<64x32xf32>
    %cst_27 = arith.constant dense<0.000000e+00> : vector<4x32xf32>
    %36 = tpu.matmul %33, %35, %cst_27 {dimension_numbers = #tpu.dot_dimension_numbers<[1], [0], [0], [1], [0, 0, 1, 1], [], []>} : vector<4x64xf32>, vector<64x32xf32>, vector<4x32xf32> -> vector<4x32xf32>
    %c0_28 = arith.constant 0 : index
    %c0_29 = arith.constant 0 : index
    %c0_30 = arith.constant 0 : index
    %37 = vector.load %arg9[%c0_28, %c0_29, %c0_30] : memref<8x1x32xf32, #tpu.memory_space<vmem>>, vector<1x1x32xf32>
    %38 = vector.shape_cast %37 : vector<1x1x32xf32> to vector<1x32xf32>
    %39 = vector.broadcast %38 : vector<1x32xf32> to vector<4x32xf32>
    %40 = arith.addf %36, %39 : vector<4x32xf32>
    %c0_31 = arith.constant 0 : index
    %c0_32 = arith.constant 0 : index
    %c0_33 = arith.constant 0 : index
    %41 = vector.load %arg10[%c0_31, %c0_32, %c0_33] : memref<8x32x32xf32, #tpu.memory_space<vmem>>, vector<1x32x32xf32>
    %42 = vector.shape_cast %41 : vector<1x32x32xf32> to vector<32x32xf32>
    %cst_34 = arith.constant dense<0.000000e+00> : vector<4x32xf32>
    %43 = tpu.matmul %40, %42, %cst_34 {dimension_numbers = #tpu.dot_dimension_numbers<[1], [0], [0], [1], [0, 0, 1, 1], [], []>} : vector<4x32xf32>, vector<32x32xf32>, vector<4x32xf32> -> vector<4x32xf32>
    %c0_35 = arith.constant 0 : index
    %c0_36 = arith.constant 0 : index
    %c0_37 = arith.constant 0 : index
    %44 = vector.load %arg11[%c0_35, %c0_36, %c0_37] : memref<8x1x32xf32, #tpu.memory_space<vmem>>, vector<1x1x32xf32>
    %45 = vector.shape_cast %44 : vector<1x1x32xf32> to vector<1x32xf32>
    %46 = vector.broadcast %45 : vector<1x32xf32> to vector<4x32xf32>
    %47 = arith.addf %43, %46 : vector<4x32xf32>
    %cst_38 = arith.constant 0.000000e+00 : f32
    %48 = vector.broadcast %cst_38 : f32 to vector<4x32xf32>
    %49 = arith.maximumf %47, %48 : vector<4x32xf32>
    %c0_39 = arith.constant 0 : index
    %c0_40 = arith.constant 0 : index
    %c0_41 = arith.constant 0 : index
    %50 = vector.load %arg12[%c0_39, %c0_40, %c0_41] : memref<8x32x1xf32, #tpu.memory_space<vmem>>, vector<1x32x1xf32>
    %51 = vector.shape_cast %50 : vector<1x32x1xf32> to vector<32x1xf32>
    %cst_42 = arith.constant dense<0.000000e+00> : vector<4x1xf32>
    %52 = tpu.matmul %49, %51, %cst_42 {dimension_numbers = #tpu.dot_dimension_numbers<[1], [0], [0], [1], [0, 0, 1, 1], [], []>} : vector<4x32xf32>, vector<32x1xf32>, vector<4x1xf32> -> vector<4x1xf32>
    %c0_43 = arith.constant 0 : index
    %c0_44 = arith.constant 0 : index
    %c0_45 = arith.constant 0 : index
    %53 = vector.load %arg13[%c0_43, %c0_44, %c0_45] : memref<8x1x1xf32, #tpu.memory_space<vmem>>, vector<1x1x1xf32>
    %54 = vector.shape_cast %53 : vector<1x1x1xf32> to vector<1x1xf32>
    %55 = vector.broadcast %54 : vector<1x1xf32> to vector<4x1xf32>
    %56 = arith.addf %52, %55 : vector<4x1xf32>
    %cst_46 = arith.constant 0.000000e+00 : f32
    %57 = vector.broadcast %cst_46 : f32 to vector<4x1xf32>
    %58 = arith.subf %57, %56 : vector<4x1xf32>
    %59 = math.exp %58 : vector<4x1xf32>
    %cst_47 = arith.constant 1.000000e+00 : f32
    %60 = vector.broadcast %cst_47 : f32 to vector<4x1xf32>
    %61 = arith.addf %60, %59 : vector<4x1xf32>
    %cst_48 = arith.constant 1.000000e+00 : f32
    %62 = vector.broadcast %cst_48 : f32 to vector<4x1xf32>
    %63 = arith.divf %62, %61 : vector<4x1xf32>
    %c0_i32 = arith.constant 0 : i32
    %64 = vector.broadcast %c0_i32 : i32 to vector<4x8xi32>
    %65 = arith.cmpi eq, %23, %64 : vector<4x8xi32>
    %cst_49 = arith.constant 0.000000e+00 : f32
    %66 = vector.shape_cast %63 : vector<4x1xf32> to vector<4x1xf32>
    %67 = vector.broadcast %66 : vector<4x1xf32> to vector<4x8xf32>
    %68 = vector.broadcast %cst_49 : f32 to vector<4x8xf32>
    %69 = arith.select %65, %67, %68 : vector<4x8xi1>, vector<4x8xf32>
    %70 = arith.addf %24, %69 : vector<4x8xf32>
    %c1 = arith.constant 1 : index
    %c0_50 = arith.constant 0 : index
    %c0_51 = arith.constant 0 : index
    %71 = vector.load %arg6[%c1, %c0_50, %c0_51] : memref<8x32x64xf32, #tpu.memory_space<vmem>>, vector<1x32x64xf32>
    %72 = vector.shape_cast %71 : vector<1x32x64xf32> to vector<32x64xf32>
    %cst_52 = arith.constant dense<0.000000e+00> : vector<4x64xf32>
    %73 = tpu.matmul %0, %72, %cst_52 {dimension_numbers = #tpu.dot_dimension_numbers<[1], [0], [0], [1], [0, 0, 1, 1], [], []>} : vector<4x32xf32>, vector<32x64xf32>, vector<4x64xf32> -> vector<4x64xf32>
    %c1_53 = arith.constant 1 : index
    %c0_54 = arith.constant 0 : index
    %c0_55 = arith.constant 0 : index
    %74 = vector.load %arg7[%c1_53, %c0_54, %c0_55] : memref<8x1x64xf32, #tpu.memory_space<vmem>>, vector<1x1x64xf32>
    %75 = vector.shape_cast %74 : vector<1x1x64xf32> to vector<1x64xf32>
    %76 = vector.broadcast %75 : vector<1x64xf32> to vector<4x64xf32>
    %77 = arith.addf %73, %76 : vector<4x64xf32>
    %cst_56 = arith.constant 0.000000e+00 : f32
    %78 = vector.broadcast %cst_56 : f32 to vector<4x64xf32>
    %79 = arith.maximumf %77, %78 : vector<4x64xf32>
    %c1_57 = arith.constant 1 : index
    %c0_58 = arith.constant 0 : index
    %c0_59 = arith.constant 0 : index
    %80 = vector.load %arg8[%c1_57, %c0_58, %c0_59] : memref<8x64x32xf32, #tpu.memory_space<vmem>>, vector<1x64x32xf32>
    %81 = vector.shape_cast %80 : vector<1x64x32xf32> to vector<64x32xf32>
    %cst_60 = arith.constant dense<0.000000e+00> : vector<4x32xf32>
    %82 = tpu.matmul %79, %81, %cst_60 {dimension_numbers = #tpu.dot_dimension_numbers<[1], [0], [0], [1], [0, 0, 1, 1], [], []>} : vector<4x64xf32>, vector<64x32xf32>, vector<4x32xf32> -> vector<4x32xf32>
    %c1_61 = arith.constant 1 : index
    %c0_62 = arith.constant 0 : index
    %c0_63 = arith.constant 0 : index
    %83 = vector.load %arg9[%c1_61, %c0_62, %c0_63] : memref<8x1x32xf32, #tpu.memory_space<vmem>>, vector<1x1x32xf32>
    %84 = vector.shape_cast %83 : vector<1x1x32xf32> to vector<1x32xf32>
    %85 = vector.broadcast %84 : vector<1x32xf32> to vector<4x32xf32>
    %86 = arith.addf %82, %85 : vector<4x32xf32>
    %c1_64 = arith.constant 1 : index
    %c0_65 = arith.constant 0 : index
    %c0_66 = arith.constant 0 : index
    %87 = vector.load %arg10[%c1_64, %c0_65, %c0_66] : memref<8x32x32xf32, #tpu.memory_space<vmem>>, vector<1x32x32xf32>
    %88 = vector.shape_cast %87 : vector<1x32x32xf32> to vector<32x32xf32>
    %cst_67 = arith.constant dense<0.000000e+00> : vector<4x32xf32>
    %89 = tpu.matmul %86, %88, %cst_67 {dimension_numbers = #tpu.dot_dimension_numbers<[1], [0], [0], [1], [0, 0, 1, 1], [], []>} : vector<4x32xf32>, vector<32x32xf32>, vector<4x32xf32> -> vector<4x32xf32>
    %c1_68 = arith.constant 1 : index
    %c0_69 = arith.constant 0 : index
    %c0_70 = arith.constant 0 : index
    %90 = vector.load %arg11[%c1_68, %c0_69, %c0_70] : memref<8x1x32xf32, #tpu.memory_space<vmem>>, vector<1x1x32xf32>
    %91 = vector.shape_cast %90 : vector<1x1x32xf32> to vector<1x32xf32>
    %92 = vector.broadcast %91 : vector<1x32xf32> to vector<4x32xf32>
    %93 = arith.addf %89, %92 : vector<4x32xf32>
    %cst_71 = arith.constant 0.000000e+00 : f32
    %94 = vector.broadcast %cst_71 : f32 to vector<4x32xf32>
    %95 = arith.maximumf %93, %94 : vector<4x32xf32>
    %c1_72 = arith.constant 1 : index
    %c0_73 = arith.constant 0 : index
    %c0_74 = arith.constant 0 : index
    %96 = vector.load %arg12[%c1_72, %c0_73, %c0_74] : memref<8x32x1xf32, #tpu.memory_space<vmem>>, vector<1x32x1xf32>
    %97 = vector.shape_cast %96 : vector<1x32x1xf32> to vector<32x1xf32>
    %cst_75 = arith.constant dense<0.000000e+00> : vector<4x1xf32>
    %98 = tpu.matmul %95, %97, %cst_75 {dimension_numbers = #tpu.dot_dimension_numbers<[1], [0], [0], [1], [0, 0, 1, 1], [], []>} : vector<4x32xf32>, vector<32x1xf32>, vector<4x1xf32> -> vector<4x1xf32>
    %c1_76 = arith.constant 1 : index
    %c0_77 = arith.constant 0 : index
    %c0_78 = arith.constant 0 : index
    %99 = vector.load %arg13[%c1_76, %c0_77, %c0_78] : memref<8x1x1xf32, #tpu.memory_space<vmem>>, vector<1x1x1xf32>
    %100 = vector.shape_cast %99 : vector<1x1x1xf32> to vector<1x1xf32>
    %101 = vector.broadcast %100 : vector<1x1xf32> to vector<4x1xf32>
    %102 = arith.addf %98, %101 : vector<4x1xf32>
    %cst_79 = arith.constant 0.000000e+00 : f32
    %103 = vector.broadcast %cst_79 : f32 to vector<4x1xf32>
    %104 = arith.subf %103, %102 : vector<4x1xf32>
    %105 = math.exp %104 : vector<4x1xf32>
    %cst_80 = arith.constant 1.000000e+00 : f32
    %106 = vector.broadcast %cst_80 : f32 to vector<4x1xf32>
    %107 = arith.addf %106, %105 : vector<4x1xf32>
    %cst_81 = arith.constant 1.000000e+00 : f32
    %108 = vector.broadcast %cst_81 : f32 to vector<4x1xf32>
    %109 = arith.divf %108, %107 : vector<4x1xf32>
    %c1_i32 = arith.constant 1 : i32
    %110 = vector.broadcast %c1_i32 : i32 to vector<4x8xi32>
    %111 = arith.cmpi eq, %23, %110 : vector<4x8xi32>
    %cst_82 = arith.constant 0.000000e+00 : f32
    %112 = vector.shape_cast %109 : vector<4x1xf32> to vector<4x1xf32>
    %113 = vector.broadcast %112 : vector<4x1xf32> to vector<4x8xf32>
    %114 = vector.broadcast %cst_82 : f32 to vector<4x8xf32>
    %115 = arith.select %111, %113, %114 : vector<4x8xi1>, vector<4x8xf32>
    %116 = arith.addf %70, %115 : vector<4x8xf32>
    %c2 = arith.constant 2 : index
    %c0_83 = arith.constant 0 : index
    %c0_84 = arith.constant 0 : index
    %117 = vector.load %arg6[%c2, %c0_83, %c0_84] : memref<8x32x64xf32, #tpu.memory_space<vmem>>, vector<1x32x64xf32>
    %118 = vector.shape_cast %117 : vector<1x32x64xf32> to vector<32x64xf32>
    %cst_85 = arith.constant dense<0.000000e+00> : vector<4x64xf32>
    %119 = tpu.matmul %0, %118, %cst_85 {dimension_numbers = #tpu.dot_dimension_numbers<[1], [0], [0], [1], [0, 0, 1, 1], [], []>} : vector<4x32xf32>, vector<32x64xf32>, vector<4x64xf32> -> vector<4x64xf32>
    %c2_86 = arith.constant 2 : index
    %c0_87 = arith.constant 0 : index
    %c0_88 = arith.constant 0 : index
    %120 = vector.load %arg7[%c2_86, %c0_87, %c0_88] : memref<8x1x64xf32, #tpu.memory_space<vmem>>, vector<1x1x64xf32>
    %121 = vector.shape_cast %120 : vector<1x1x64xf32> to vector<1x64xf32>
    %122 = vector.broadcast %121 : vector<1x64xf32> to vector<4x64xf32>
    %123 = arith.addf %119, %122 : vector<4x64xf32>
    %cst_89 = arith.constant 0.000000e+00 : f32
    %124 = vector.broadcast %cst_89 : f32 to vector<4x64xf32>
    %125 = arith.maximumf %123, %124 : vector<4x64xf32>
    %c2_90 = arith.constant 2 : index
    %c0_91 = arith.constant 0 : index
    %c0_92 = arith.constant 0 : index
    %126 = vector.load %arg8[%c2_90, %c0_91, %c0_92] : memref<8x64x32xf32, #tpu.memory_space<vmem>>, vector<1x64x32xf32>
    %127 = vector.shape_cast %126 : vector<1x64x32xf32> to vector<64x32xf32>
    %cst_93 = arith.constant dense<0.000000e+00> : vector<4x32xf32>
    %128 = tpu.matmul %125, %127, %cst_93 {dimension_numbers = #tpu.dot_dimension_numbers<[1], [0], [0], [1], [0, 0, 1, 1], [], []>} : vector<4x64xf32>, vector<64x32xf32>, vector<4x32xf32> -> vector<4x32xf32>
    %c2_94 = arith.constant 2 : index
    %c0_95 = arith.constant 0 : index
    %c0_96 = arith.constant 0 : index
    %129 = vector.load %arg9[%c2_94, %c0_95, %c0_96] : memref<8x1x32xf32, #tpu.memory_space<vmem>>, vector<1x1x32xf32>
    %130 = vector.shape_cast %129 : vector<1x1x32xf32> to vector<1x32xf32>
    %131 = vector.broadcast %130 : vector<1x32xf32> to vector<4x32xf32>
    %132 = arith.addf %128, %131 : vector<4x32xf32>
    %c2_97 = arith.constant 2 : index
    %c0_98 = arith.constant 0 : index
    %c0_99 = arith.constant 0 : index
    %133 = vector.load %arg10[%c2_97, %c0_98, %c0_99] : memref<8x32x32xf32, #tpu.memory_space<vmem>>, vector<1x32x32xf32>
    %134 = vector.shape_cast %133 : vector<1x32x32xf32> to vector<32x32xf32>
    %cst_100 = arith.constant dense<0.000000e+00> : vector<4x32xf32>
    %135 = tpu.matmul %132, %134, %cst_100 {dimension_numbers = #tpu.dot_dimension_numbers<[1], [0], [0], [1], [0, 0, 1, 1], [], []>} : vector<4x32xf32>, vector<32x32xf32>, vector<4x32xf32> -> vector<4x32xf32>
    %c2_101 = arith.constant 2 : index
    %c0_102 = arith.constant 0 : index
    %c0_103 = arith.constant 0 : index
    %136 = vector.load %arg11[%c2_101, %c0_102, %c0_103] : memref<8x1x32xf32, #tpu.memory_space<vmem>>, vector<1x1x32xf32>
    %137 = vector.shape_cast %136 : vector<1x1x32xf32> to vector<1x32xf32>
    %138 = vector.broadcast %137 : vector<1x32xf32> to vector<4x32xf32>
    %139 = arith.addf %135, %138 : vector<4x32xf32>
    %cst_104 = arith.constant 0.000000e+00 : f32
    %140 = vector.broadcast %cst_104 : f32 to vector<4x32xf32>
    %141 = arith.maximumf %139, %140 : vector<4x32xf32>
    %c2_105 = arith.constant 2 : index
    %c0_106 = arith.constant 0 : index
    %c0_107 = arith.constant 0 : index
    %142 = vector.load %arg12[%c2_105, %c0_106, %c0_107] : memref<8x32x1xf32, #tpu.memory_space<vmem>>, vector<1x32x1xf32>
    %143 = vector.shape_cast %142 : vector<1x32x1xf32> to vector<32x1xf32>
    %cst_108 = arith.constant dense<0.000000e+00> : vector<4x1xf32>
    %144 = tpu.matmul %141, %143, %cst_108 {dimension_numbers = #tpu.dot_dimension_numbers<[1], [0], [0], [1], [0, 0, 1, 1], [], []>} : vector<4x32xf32>, vector<32x1xf32>, vector<4x1xf32> -> vector<4x1xf32>
    %c2_109 = arith.constant 2 : index
    %c0_110 = arith.constant 0 : index
    %c0_111 = arith.constant 0 : index
    %145 = vector.load %arg13[%c2_109, %c0_110, %c0_111] : memref<8x1x1xf32, #tpu.memory_space<vmem>>, vector<1x1x1xf32>
    %146 = vector.shape_cast %145 : vector<1x1x1xf32> to vector<1x1xf32>
    %147 = vector.broadcast %146 : vector<1x1xf32> to vector<4x1xf32>
    %148 = arith.addf %144, %147 : vector<4x1xf32>
    %cst_112 = arith.constant 0.000000e+00 : f32
    %149 = vector.broadcast %cst_112 : f32 to vector<4x1xf32>
    %150 = arith.subf %149, %148 : vector<4x1xf32>
    %151 = math.exp %150 : vector<4x1xf32>
    %cst_113 = arith.constant 1.000000e+00 : f32
    %152 = vector.broadcast %cst_113 : f32 to vector<4x1xf32>
    %153 = arith.addf %152, %151 : vector<4x1xf32>
    %cst_114 = arith.constant 1.000000e+00 : f32
    %154 = vector.broadcast %cst_114 : f32 to vector<4x1xf32>
    %155 = arith.divf %154, %153 : vector<4x1xf32>
    %c2_i32 = arith.constant 2 : i32
    %156 = vector.broadcast %c2_i32 : i32 to vector<4x8xi32>
    %157 = arith.cmpi eq, %23, %156 : vector<4x8xi32>
    %cst_115 = arith.constant 0.000000e+00 : f32
    %158 = vector.shape_cast %155 : vector<4x1xf32> to vector<4x1xf32>
    %159 = vector.broadcast %158 : vector<4x1xf32> to vector<4x8xf32>
    %160 = vector.broadcast %cst_115 : f32 to vector<4x8xf32>
    %161 = arith.select %157, %159, %160 : vector<4x8xi1>, vector<4x8xf32>
    %162 = arith.addf %116, %161 : vector<4x8xf32>
    %c3 = arith.constant 3 : index
    %c0_116 = arith.constant 0 : index
    %c0_117 = arith.constant 0 : index
    %163 = vector.load %arg6[%c3, %c0_116, %c0_117] : memref<8x32x64xf32, #tpu.memory_space<vmem>>, vector<1x32x64xf32>
    %164 = vector.shape_cast %163 : vector<1x32x64xf32> to vector<32x64xf32>
    %cst_118 = arith.constant dense<0.000000e+00> : vector<4x64xf32>
    %165 = tpu.matmul %0, %164, %cst_118 {dimension_numbers = #tpu.dot_dimension_numbers<[1], [0], [0], [1], [0, 0, 1, 1], [], []>} : vector<4x32xf32>, vector<32x64xf32>, vector<4x64xf32> -> vector<4x64xf32>
    %c3_119 = arith.constant 3 : index
    %c0_120 = arith.constant 0 : index
    %c0_121 = arith.constant 0 : index
    %166 = vector.load %arg7[%c3_119, %c0_120, %c0_121] : memref<8x1x64xf32, #tpu.memory_space<vmem>>, vector<1x1x64xf32>
    %167 = vector.shape_cast %166 : vector<1x1x64xf32> to vector<1x64xf32>
    %168 = vector.broadcast %167 : vector<1x64xf32> to vector<4x64xf32>
    %169 = arith.addf %165, %168 : vector<4x64xf32>
    %cst_122 = arith.constant 0.000000e+00 : f32
    %170 = vector.broadcast %cst_122 : f32 to vector<4x64xf32>
    %171 = arith.maximumf %169, %170 : vector<4x64xf32>
    %c3_123 = arith.constant 3 : index
    %c0_124 = arith.constant 0 : index
    %c0_125 = arith.constant 0 : index
    %172 = vector.load %arg8[%c3_123, %c0_124, %c0_125] : memref<8x64x32xf32, #tpu.memory_space<vmem>>, vector<1x64x32xf32>
    %173 = vector.shape_cast %172 : vector<1x64x32xf32> to vector<64x32xf32>
    %cst_126 = arith.constant dense<0.000000e+00> : vector<4x32xf32>
    %174 = tpu.matmul %171, %173, %cst_126 {dimension_numbers = #tpu.dot_dimension_numbers<[1], [0], [0], [1], [0, 0, 1, 1], [], []>} : vector<4x64xf32>, vector<64x32xf32>, vector<4x32xf32> -> vector<4x32xf32>
    %c3_127 = arith.constant 3 : index
    %c0_128 = arith.constant 0 : index
    %c0_129 = arith.constant 0 : index
    %175 = vector.load %arg9[%c3_127, %c0_128, %c0_129] : memref<8x1x32xf32, #tpu.memory_space<vmem>>, vector<1x1x32xf32>
    %176 = vector.shape_cast %175 : vector<1x1x32xf32> to vector<1x32xf32>
    %177 = vector.broadcast %176 : vector<1x32xf32> to vector<4x32xf32>
    %178 = arith.addf %174, %177 : vector<4x32xf32>
    %c3_130 = arith.constant 3 : index
    %c0_131 = arith.constant 0 : index
    %c0_132 = arith.constant 0 : index
    %179 = vector.load %arg10[%c3_130, %c0_131, %c0_132] : memref<8x32x32xf32, #tpu.memory_space<vmem>>, vector<1x32x32xf32>
    %180 = vector.shape_cast %179 : vector<1x32x32xf32> to vector<32x32xf32>
    %cst_133 = arith.constant dense<0.000000e+00> : vector<4x32xf32>
    %181 = tpu.matmul %178, %180, %cst_133 {dimension_numbers = #tpu.dot_dimension_numbers<[1], [0], [0], [1], [0, 0, 1, 1], [], []>} : vector<4x32xf32>, vector<32x32xf32>, vector<4x32xf32> -> vector<4x32xf32>
    %c3_134 = arith.constant 3 : index
    %c0_135 = arith.constant 0 : index
    %c0_136 = arith.constant 0 : index
    %182 = vector.load %arg11[%c3_134, %c0_135, %c0_136] : memref<8x1x32xf32, #tpu.memory_space<vmem>>, vector<1x1x32xf32>
    %183 = vector.shape_cast %182 : vector<1x1x32xf32> to vector<1x32xf32>
    %184 = vector.broadcast %183 : vector<1x32xf32> to vector<4x32xf32>
    %185 = arith.addf %181, %184 : vector<4x32xf32>
    %cst_137 = arith.constant 0.000000e+00 : f32
    %186 = vector.broadcast %cst_137 : f32 to vector<4x32xf32>
    %187 = arith.maximumf %185, %186 : vector<4x32xf32>
    %c3_138 = arith.constant 3 : index
    %c0_139 = arith.constant 0 : index
    %c0_140 = arith.constant 0 : index
    %188 = vector.load %arg12[%c3_138, %c0_139, %c0_140] : memref<8x32x1xf32, #tpu.memory_space<vmem>>, vector<1x32x1xf32>
    %189 = vector.shape_cast %188 : vector<1x32x1xf32> to vector<32x1xf32>
    %cst_141 = arith.constant dense<0.000000e+00> : vector<4x1xf32>
    %190 = tpu.matmul %187, %189, %cst_141 {dimension_numbers = #tpu.dot_dimension_numbers<[1], [0], [0], [1], [0, 0, 1, 1], [], []>} : vector<4x32xf32>, vector<32x1xf32>, vector<4x1xf32> -> vector<4x1xf32>
    %c3_142 = arith.constant 3 : index
    %c0_143 = arith.constant 0 : index
    %c0_144 = arith.constant 0 : index
    %191 = vector.load %arg13[%c3_142, %c0_143, %c0_144] : memref<8x1x1xf32, #tpu.memory_space<vmem>>, vector<1x1x1xf32>
    %192 = vector.shape_cast %191 : vector<1x1x1xf32> to vector<1x1xf32>
    %193 = vector.broadcast %192 : vector<1x1xf32> to vector<4x1xf32>
    %194 = arith.addf %190, %193 : vector<4x1xf32>
    %cst_145 = arith.constant 0.000000e+00 : f32
    %195 = vector.broadcast %cst_145 : f32 to vector<4x1xf32>
    %196 = arith.subf %195, %194 : vector<4x1xf32>
    %197 = math.exp %196 : vector<4x1xf32>
    %cst_146 = arith.constant 1.000000e+00 : f32
    %198 = vector.broadcast %cst_146 : f32 to vector<4x1xf32>
    %199 = arith.addf %198, %197 : vector<4x1xf32>
    %cst_147 = arith.constant 1.000000e+00 : f32
    %200 = vector.broadcast %cst_147 : f32 to vector<4x1xf32>
    %201 = arith.divf %200, %199 : vector<4x1xf32>
    %c3_i32 = arith.constant 3 : i32
    %202 = vector.broadcast %c3_i32 : i32 to vector<4x8xi32>
    %203 = arith.cmpi eq, %23, %202 : vector<4x8xi32>
    %cst_148 = arith.constant 0.000000e+00 : f32
    %204 = vector.shape_cast %201 : vector<4x1xf32> to vector<4x1xf32>
    %205 = vector.broadcast %204 : vector<4x1xf32> to vector<4x8xf32>
    %206 = vector.broadcast %cst_148 : f32 to vector<4x8xf32>
    %207 = arith.select %203, %205, %206 : vector<4x8xi1>, vector<4x8xf32>
    %208 = arith.addf %162, %207 : vector<4x8xf32>
    %c4 = arith.constant 4 : index
    %c0_149 = arith.constant 0 : index
    %c0_150 = arith.constant 0 : index
    %209 = vector.load %arg6[%c4, %c0_149, %c0_150] : memref<8x32x64xf32, #tpu.memory_space<vmem>>, vector<1x32x64xf32>
    %210 = vector.shape_cast %209 : vector<1x32x64xf32> to vector<32x64xf32>
    %cst_151 = arith.constant dense<0.000000e+00> : vector<4x64xf32>
    %211 = tpu.matmul %0, %210, %cst_151 {dimension_numbers = #tpu.dot_dimension_numbers<[1], [0], [0], [1], [0, 0, 1, 1], [], []>} : vector<4x32xf32>, vector<32x64xf32>, vector<4x64xf32> -> vector<4x64xf32>
    %c4_152 = arith.constant 4 : index
    %c0_153 = arith.constant 0 : index
    %c0_154 = arith.constant 0 : index
    %212 = vector.load %arg7[%c4_152, %c0_153, %c0_154] : memref<8x1x64xf32, #tpu.memory_space<vmem>>, vector<1x1x64xf32>
    %213 = vector.shape_cast %212 : vector<1x1x64xf32> to vector<1x64xf32>
    %214 = vector.broadcast %213 : vector<1x64xf32> to vector<4x64xf32>
    %215 = arith.addf %211, %214 : vector<4x64xf32>
    %cst_155 = arith.constant 0.000000e+00 : f32
    %216 = vector.broadcast %cst_155 : f32 to vector<4x64xf32>
    %217 = arith.maximumf %215, %216 : vector<4x64xf32>
    %c4_156 = arith.constant 4 : index
    %c0_157 = arith.constant 0 : index
    %c0_158 = arith.constant 0 : index
    %218 = vector.load %arg8[%c4_156, %c0_157, %c0_158] : memref<8x64x32xf32, #tpu.memory_space<vmem>>, vector<1x64x32xf32>
    %219 = vector.shape_cast %218 : vector<1x64x32xf32> to vector<64x32xf32>
    %cst_159 = arith.constant dense<0.000000e+00> : vector<4x32xf32>
    %220 = tpu.matmul %217, %219, %cst_159 {dimension_numbers = #tpu.dot_dimension_numbers<[1], [0], [0], [1], [0, 0, 1, 1], [], []>} : vector<4x64xf32>, vector<64x32xf32>, vector<4x32xf32> -> vector<4x32xf32>
    %c4_160 = arith.constant 4 : index
    %c0_161 = arith.constant 0 : index
    %c0_162 = arith.constant 0 : index
    %221 = vector.load %arg9[%c4_160, %c0_161, %c0_162] : memref<8x1x32xf32, #tpu.memory_space<vmem>>, vector<1x1x32xf32>
    %222 = vector.shape_cast %221 : vector<1x1x32xf32> to vector<1x32xf32>
    %223 = vector.broadcast %222 : vector<1x32xf32> to vector<4x32xf32>
    %224 = arith.addf %220, %223 : vector<4x32xf32>
    %c4_163 = arith.constant 4 : index
    %c0_164 = arith.constant 0 : index
    %c0_165 = arith.constant 0 : index
    %225 = vector.load %arg10[%c4_163, %c0_164, %c0_165] : memref<8x32x32xf32, #tpu.memory_space<vmem>>, vector<1x32x32xf32>
    %226 = vector.shape_cast %225 : vector<1x32x32xf32> to vector<32x32xf32>
    %cst_166 = arith.constant dense<0.000000e+00> : vector<4x32xf32>
    %227 = tpu.matmul %224, %226, %cst_166 {dimension_numbers = #tpu.dot_dimension_numbers<[1], [0], [0], [1], [0, 0, 1, 1], [], []>} : vector<4x32xf32>, vector<32x32xf32>, vector<4x32xf32> -> vector<4x32xf32>
    %c4_167 = arith.constant 4 : index
    %c0_168 = arith.constant 0 : index
    %c0_169 = arith.constant 0 : index
    %228 = vector.load %arg11[%c4_167, %c0_168, %c0_169] : memref<8x1x32xf32, #tpu.memory_space<vmem>>, vector<1x1x32xf32>
    %229 = vector.shape_cast %228 : vector<1x1x32xf32> to vector<1x32xf32>
    %230 = vector.broadcast %229 : vector<1x32xf32> to vector<4x32xf32>
    %231 = arith.addf %227, %230 : vector<4x32xf32>
    %cst_170 = arith.constant 0.000000e+00 : f32
    %232 = vector.broadcast %cst_170 : f32 to vector<4x32xf32>
    %233 = arith.maximumf %231, %232 : vector<4x32xf32>
    %c4_171 = arith.constant 4 : index
    %c0_172 = arith.constant 0 : index
    %c0_173 = arith.constant 0 : index
    %234 = vector.load %arg12[%c4_171, %c0_172, %c0_173] : memref<8x32x1xf32, #tpu.memory_space<vmem>>, vector<1x32x1xf32>
    %235 = vector.shape_cast %234 : vector<1x32x1xf32> to vector<32x1xf32>
    %cst_174 = arith.constant dense<0.000000e+00> : vector<4x1xf32>
    %236 = tpu.matmul %233, %235, %cst_174 {dimension_numbers = #tpu.dot_dimension_numbers<[1], [0], [0], [1], [0, 0, 1, 1], [], []>} : vector<4x32xf32>, vector<32x1xf32>, vector<4x1xf32> -> vector<4x1xf32>
    %c4_175 = arith.constant 4 : index
    %c0_176 = arith.constant 0 : index
    %c0_177 = arith.constant 0 : index
    %237 = vector.load %arg13[%c4_175, %c0_176, %c0_177] : memref<8x1x1xf32, #tpu.memory_space<vmem>>, vector<1x1x1xf32>
    %238 = vector.shape_cast %237 : vector<1x1x1xf32> to vector<1x1xf32>
    %239 = vector.broadcast %238 : vector<1x1xf32> to vector<4x1xf32>
    %240 = arith.addf %236, %239 : vector<4x1xf32>
    %cst_178 = arith.constant 0.000000e+00 : f32
    %241 = vector.broadcast %cst_178 : f32 to vector<4x1xf32>
    %242 = arith.subf %241, %240 : vector<4x1xf32>
    %243 = math.exp %242 : vector<4x1xf32>
    %cst_179 = arith.constant 1.000000e+00 : f32
    %244 = vector.broadcast %cst_179 : f32 to vector<4x1xf32>
    %245 = arith.addf %244, %243 : vector<4x1xf32>
    %cst_180 = arith.constant 1.000000e+00 : f32
    %246 = vector.broadcast %cst_180 : f32 to vector<4x1xf32>
    %247 = arith.divf %246, %245 : vector<4x1xf32>
    %c4_i32 = arith.constant 4 : i32
    %248 = vector.broadcast %c4_i32 : i32 to vector<4x8xi32>
    %249 = arith.cmpi eq, %23, %248 : vector<4x8xi32>
    %cst_181 = arith.constant 0.000000e+00 : f32
    %250 = vector.shape_cast %247 : vector<4x1xf32> to vector<4x1xf32>
    %251 = vector.broadcast %250 : vector<4x1xf32> to vector<4x8xf32>
    %252 = vector.broadcast %cst_181 : f32 to vector<4x8xf32>
    %253 = arith.select %249, %251, %252 : vector<4x8xi1>, vector<4x8xf32>
    %254 = arith.addf %208, %253 : vector<4x8xf32>
    %c5 = arith.constant 5 : index
    %c0_182 = arith.constant 0 : index
    %c0_183 = arith.constant 0 : index
    %255 = vector.load %arg6[%c5, %c0_182, %c0_183] : memref<8x32x64xf32, #tpu.memory_space<vmem>>, vector<1x32x64xf32>
    %256 = vector.shape_cast %255 : vector<1x32x64xf32> to vector<32x64xf32>
    %cst_184 = arith.constant dense<0.000000e+00> : vector<4x64xf32>
    %257 = tpu.matmul %0, %256, %cst_184 {dimension_numbers = #tpu.dot_dimension_numbers<[1], [0], [0], [1], [0, 0, 1, 1], [], []>} : vector<4x32xf32>, vector<32x64xf32>, vector<4x64xf32> -> vector<4x64xf32>
    %c5_185 = arith.constant 5 : index
    %c0_186 = arith.constant 0 : index
    %c0_187 = arith.constant 0 : index
    %258 = vector.load %arg7[%c5_185, %c0_186, %c0_187] : memref<8x1x64xf32, #tpu.memory_space<vmem>>, vector<1x1x64xf32>
    %259 = vector.shape_cast %258 : vector<1x1x64xf32> to vector<1x64xf32>
    %260 = vector.broadcast %259 : vector<1x64xf32> to vector<4x64xf32>
    %261 = arith.addf %257, %260 : vector<4x64xf32>
    %cst_188 = arith.constant 0.000000e+00 : f32
    %262 = vector.broadcast %cst_188 : f32 to vector<4x64xf32>
    %263 = arith.maximumf %261, %262 : vector<4x64xf32>
    %c5_189 = arith.constant 5 : index
    %c0_190 = arith.constant 0 : index
    %c0_191 = arith.constant 0 : index
    %264 = vector.load %arg8[%c5_189, %c0_190, %c0_191] : memref<8x64x32xf32, #tpu.memory_space<vmem>>, vector<1x64x32xf32>
    %265 = vector.shape_cast %264 : vector<1x64x32xf32> to vector<64x32xf32>
    %cst_192 = arith.constant dense<0.000000e+00> : vector<4x32xf32>
    %266 = tpu.matmul %263, %265, %cst_192 {dimension_numbers = #tpu.dot_dimension_numbers<[1], [0], [0], [1], [0, 0, 1, 1], [], []>} : vector<4x64xf32>, vector<64x32xf32>, vector<4x32xf32> -> vector<4x32xf32>
    %c5_193 = arith.constant 5 : index
    %c0_194 = arith.constant 0 : index
    %c0_195 = arith.constant 0 : index
    %267 = vector.load %arg9[%c5_193, %c0_194, %c0_195] : memref<8x1x32xf32, #tpu.memory_space<vmem>>, vector<1x1x32xf32>
    %268 = vector.shape_cast %267 : vector<1x1x32xf32> to vector<1x32xf32>
    %269 = vector.broadcast %268 : vector<1x32xf32> to vector<4x32xf32>
    %270 = arith.addf %266, %269 : vector<4x32xf32>
    %c5_196 = arith.constant 5 : index
    %c0_197 = arith.constant 0 : index
    %c0_198 = arith.constant 0 : index
    %271 = vector.load %arg10[%c5_196, %c0_197, %c0_198] : memref<8x32x32xf32, #tpu.memory_space<vmem>>, vector<1x32x32xf32>
    %272 = vector.shape_cast %271 : vector<1x32x32xf32> to vector<32x32xf32>
    %cst_199 = arith.constant dense<0.000000e+00> : vector<4x32xf32>
    %273 = tpu.matmul %270, %272, %cst_199 {dimension_numbers = #tpu.dot_dimension_numbers<[1], [0], [0], [1], [0, 0, 1, 1], [], []>} : vector<4x32xf32>, vector<32x32xf32>, vector<4x32xf32> -> vector<4x32xf32>
    %c5_200 = arith.constant 5 : index
    %c0_201 = arith.constant 0 : index
    %c0_202 = arith.constant 0 : index
    %274 = vector.load %arg11[%c5_200, %c0_201, %c0_202] : memref<8x1x32xf32, #tpu.memory_space<vmem>>, vector<1x1x32xf32>
    %275 = vector.shape_cast %274 : vector<1x1x32xf32> to vector<1x32xf32>
    %276 = vector.broadcast %275 : vector<1x32xf32> to vector<4x32xf32>
    %277 = arith.addf %273, %276 : vector<4x32xf32>
    %cst_203 = arith.constant 0.000000e+00 : f32
    %278 = vector.broadcast %cst_203 : f32 to vector<4x32xf32>
    %279 = arith.maximumf %277, %278 : vector<4x32xf32>
    %c5_204 = arith.constant 5 : index
    %c0_205 = arith.constant 0 : index
    %c0_206 = arith.constant 0 : index
    %280 = vector.load %arg12[%c5_204, %c0_205, %c0_206] : memref<8x32x1xf32, #tpu.memory_space<vmem>>, vector<1x32x1xf32>
    %281 = vector.shape_cast %280 : vector<1x32x1xf32> to vector<32x1xf32>
    %cst_207 = arith.constant dense<0.000000e+00> : vector<4x1xf32>
    %282 = tpu.matmul %279, %281, %cst_207 {dimension_numbers = #tpu.dot_dimension_numbers<[1], [0], [0], [1], [0, 0, 1, 1], [], []>} : vector<4x32xf32>, vector<32x1xf32>, vector<4x1xf32> -> vector<4x1xf32>
    %c5_208 = arith.constant 5 : index
    %c0_209 = arith.constant 0 : index
    %c0_210 = arith.constant 0 : index
    %283 = vector.load %arg13[%c5_208, %c0_209, %c0_210] : memref<8x1x1xf32, #tpu.memory_space<vmem>>, vector<1x1x1xf32>
    %284 = vector.shape_cast %283 : vector<1x1x1xf32> to vector<1x1xf32>
    %285 = vector.broadcast %284 : vector<1x1xf32> to vector<4x1xf32>
    %286 = arith.addf %282, %285 : vector<4x1xf32>
    %cst_211 = arith.constant 0.000000e+00 : f32
    %287 = vector.broadcast %cst_211 : f32 to vector<4x1xf32>
    %288 = arith.subf %287, %286 : vector<4x1xf32>
    %289 = math.exp %288 : vector<4x1xf32>
    %cst_212 = arith.constant 1.000000e+00 : f32
    %290 = vector.broadcast %cst_212 : f32 to vector<4x1xf32>
    %291 = arith.addf %290, %289 : vector<4x1xf32>
    %cst_213 = arith.constant 1.000000e+00 : f32
    %292 = vector.broadcast %cst_213 : f32 to vector<4x1xf32>
    %293 = arith.divf %292, %291 : vector<4x1xf32>
    %c5_i32 = arith.constant 5 : i32
    %294 = vector.broadcast %c5_i32 : i32 to vector<4x8xi32>
    %295 = arith.cmpi eq, %23, %294 : vector<4x8xi32>
    %cst_214 = arith.constant 0.000000e+00 : f32
    %296 = vector.shape_cast %293 : vector<4x1xf32> to vector<4x1xf32>
    %297 = vector.broadcast %296 : vector<4x1xf32> to vector<4x8xf32>
    %298 = vector.broadcast %cst_214 : f32 to vector<4x8xf32>
    %299 = arith.select %295, %297, %298 : vector<4x8xi1>, vector<4x8xf32>
    %300 = arith.addf %254, %299 : vector<4x8xf32>
    %c6 = arith.constant 6 : index
    %c0_215 = arith.constant 0 : index
    %c0_216 = arith.constant 0 : index
    %301 = vector.load %arg6[%c6, %c0_215, %c0_216] : memref<8x32x64xf32, #tpu.memory_space<vmem>>, vector<1x32x64xf32>
    %302 = vector.shape_cast %301 : vector<1x32x64xf32> to vector<32x64xf32>
    %cst_217 = arith.constant dense<0.000000e+00> : vector<4x64xf32>
    %303 = tpu.matmul %0, %302, %cst_217 {dimension_numbers = #tpu.dot_dimension_numbers<[1], [0], [0], [1], [0, 0, 1, 1], [], []>} : vector<4x32xf32>, vector<32x64xf32>, vector<4x64xf32> -> vector<4x64xf32>
    %c6_218 = arith.constant 6 : index
    %c0_219 = arith.constant 0 : index
    %c0_220 = arith.constant 0 : index
    %304 = vector.load %arg7[%c6_218, %c0_219, %c0_220] : memref<8x1x64xf32, #tpu.memory_space<vmem>>, vector<1x1x64xf32>
    %305 = vector.shape_cast %304 : vector<1x1x64xf32> to vector<1x64xf32>
    %306 = vector.broadcast %305 : vector<1x64xf32> to vector<4x64xf32>
    %307 = arith.addf %303, %306 : vector<4x64xf32>
    %cst_221 = arith.constant 0.000000e+00 : f32
    %308 = vector.broadcast %cst_221 : f32 to vector<4x64xf32>
    %309 = arith.maximumf %307, %308 : vector<4x64xf32>
    %c6_222 = arith.constant 6 : index
    %c0_223 = arith.constant 0 : index
    %c0_224 = arith.constant 0 : index
    %310 = vector.load %arg8[%c6_222, %c0_223, %c0_224] : memref<8x64x32xf32, #tpu.memory_space<vmem>>, vector<1x64x32xf32>
    %311 = vector.shape_cast %310 : vector<1x64x32xf32> to vector<64x32xf32>
    %cst_225 = arith.constant dense<0.000000e+00> : vector<4x32xf32>
    %312 = tpu.matmul %309, %311, %cst_225 {dimension_numbers = #tpu.dot_dimension_numbers<[1], [0], [0], [1], [0, 0, 1, 1], [], []>} : vector<4x64xf32>, vector<64x32xf32>, vector<4x32xf32> -> vector<4x32xf32>
    %c6_226 = arith.constant 6 : index
    %c0_227 = arith.constant 0 : index
    %c0_228 = arith.constant 0 : index
    %313 = vector.load %arg9[%c6_226, %c0_227, %c0_228] : memref<8x1x32xf32, #tpu.memory_space<vmem>>, vector<1x1x32xf32>
    %314 = vector.shape_cast %313 : vector<1x1x32xf32> to vector<1x32xf32>
    %315 = vector.broadcast %314 : vector<1x32xf32> to vector<4x32xf32>
    %316 = arith.addf %312, %315 : vector<4x32xf32>
    %c6_229 = arith.constant 6 : index
    %c0_230 = arith.constant 0 : index
    %c0_231 = arith.constant 0 : index
    %317 = vector.load %arg10[%c6_229, %c0_230, %c0_231] : memref<8x32x32xf32, #tpu.memory_space<vmem>>, vector<1x32x32xf32>
    %318 = vector.shape_cast %317 : vector<1x32x32xf32> to vector<32x32xf32>
    %cst_232 = arith.constant dense<0.000000e+00> : vector<4x32xf32>
    %319 = tpu.matmul %316, %318, %cst_232 {dimension_numbers = #tpu.dot_dimension_numbers<[1], [0], [0], [1], [0, 0, 1, 1], [], []>} : vector<4x32xf32>, vector<32x32xf32>, vector<4x32xf32> -> vector<4x32xf32>
    %c6_233 = arith.constant 6 : index
    %c0_234 = arith.constant 0 : index
    %c0_235 = arith.constant 0 : index
    %320 = vector.load %arg11[%c6_233, %c0_234, %c0_235] : memref<8x1x32xf32, #tpu.memory_space<vmem>>, vector<1x1x32xf32>
    %321 = vector.shape_cast %320 : vector<1x1x32xf32> to vector<1x32xf32>
    %322 = vector.broadcast %321 : vector<1x32xf32> to vector<4x32xf32>
    %323 = arith.addf %319, %322 : vector<4x32xf32>
    %cst_236 = arith.constant 0.000000e+00 : f32
    %324 = vector.broadcast %cst_236 : f32 to vector<4x32xf32>
    %325 = arith.maximumf %323, %324 : vector<4x32xf32>
    %c6_237 = arith.constant 6 : index
    %c0_238 = arith.constant 0 : index
    %c0_239 = arith.constant 0 : index
    %326 = vector.load %arg12[%c6_237, %c0_238, %c0_239] : memref<8x32x1xf32, #tpu.memory_space<vmem>>, vector<1x32x1xf32>
    %327 = vector.shape_cast %326 : vector<1x32x1xf32> to vector<32x1xf32>
    %cst_240 = arith.constant dense<0.000000e+00> : vector<4x1xf32>
    %328 = tpu.matmul %325, %327, %cst_240 {dimension_numbers = #tpu.dot_dimension_numbers<[1], [0], [0], [1], [0, 0, 1, 1], [], []>} : vector<4x32xf32>, vector<32x1xf32>, vector<4x1xf32> -> vector<4x1xf32>
    %c6_241 = arith.constant 6 : index
    %c0_242 = arith.constant 0 : index
    %c0_243 = arith.constant 0 : index
    %329 = vector.load %arg13[%c6_241, %c0_242, %c0_243] : memref<8x1x1xf32, #tpu.memory_space<vmem>>, vector<1x1x1xf32>
    %330 = vector.shape_cast %329 : vector<1x1x1xf32> to vector<1x1xf32>
    %331 = vector.broadcast %330 : vector<1x1xf32> to vector<4x1xf32>
    %332 = arith.addf %328, %331 : vector<4x1xf32>
    %cst_244 = arith.constant 0.000000e+00 : f32
    %333 = vector.broadcast %cst_244 : f32 to vector<4x1xf32>
    %334 = arith.subf %333, %332 : vector<4x1xf32>
    %335 = math.exp %334 : vector<4x1xf32>
    %cst_245 = arith.constant 1.000000e+00 : f32
    %336 = vector.broadcast %cst_245 : f32 to vector<4x1xf32>
    %337 = arith.addf %336, %335 : vector<4x1xf32>
    %cst_246 = arith.constant 1.000000e+00 : f32
    %338 = vector.broadcast %cst_246 : f32 to vector<4x1xf32>
    %339 = arith.divf %338, %337 : vector<4x1xf32>
    %c6_i32 = arith.constant 6 : i32
    %340 = vector.broadcast %c6_i32 : i32 to vector<4x8xi32>
    %341 = arith.cmpi eq, %23, %340 : vector<4x8xi32>
    %cst_247 = arith.constant 0.000000e+00 : f32
    %342 = vector.shape_cast %339 : vector<4x1xf32> to vector<4x1xf32>
    %343 = vector.broadcast %342 : vector<4x1xf32> to vector<4x8xf32>
    %344 = vector.broadcast %cst_247 : f32 to vector<4x8xf32>
    %345 = arith.select %341, %343, %344 : vector<4x8xi1>, vector<4x8xf32>
    %346 = arith.addf %300, %345 : vector<4x8xf32>
    %c7 = arith.constant 7 : index
    %c0_248 = arith.constant 0 : index
    %c0_249 = arith.constant 0 : index
    %347 = vector.load %arg6[%c7, %c0_248, %c0_249] : memref<8x32x64xf32, #tpu.memory_space<vmem>>, vector<1x32x64xf32>
    %348 = vector.shape_cast %347 : vector<1x32x64xf32> to vector<32x64xf32>
    %cst_250 = arith.constant dense<0.000000e+00> : vector<4x64xf32>
    %349 = tpu.matmul %0, %348, %cst_250 {dimension_numbers = #tpu.dot_dimension_numbers<[1], [0], [0], [1], [0, 0, 1, 1], [], []>} : vector<4x32xf32>, vector<32x64xf32>, vector<4x64xf32> -> vector<4x64xf32>
    %c7_251 = arith.constant 7 : index
    %c0_252 = arith.constant 0 : index
    %c0_253 = arith.constant 0 : index
    %350 = vector.load %arg7[%c7_251, %c0_252, %c0_253] : memref<8x1x64xf32, #tpu.memory_space<vmem>>, vector<1x1x64xf32>
    %351 = vector.shape_cast %350 : vector<1x1x64xf32> to vector<1x64xf32>
    %352 = vector.broadcast %351 : vector<1x64xf32> to vector<4x64xf32>
    %353 = arith.addf %349, %352 : vector<4x64xf32>
    %cst_254 = arith.constant 0.000000e+00 : f32
    %354 = vector.broadcast %cst_254 : f32 to vector<4x64xf32>
    %355 = arith.maximumf %353, %354 : vector<4x64xf32>
    %c7_255 = arith.constant 7 : index
    %c0_256 = arith.constant 0 : index
    %c0_257 = arith.constant 0 : index
    %356 = vector.load %arg8[%c7_255, %c0_256, %c0_257] : memref<8x64x32xf32, #tpu.memory_space<vmem>>, vector<1x64x32xf32>
    %357 = vector.shape_cast %356 : vector<1x64x32xf32> to vector<64x32xf32>
    %cst_258 = arith.constant dense<0.000000e+00> : vector<4x32xf32>
    %358 = tpu.matmul %355, %357, %cst_258 {dimension_numbers = #tpu.dot_dimension_numbers<[1], [0], [0], [1], [0, 0, 1, 1], [], []>} : vector<4x64xf32>, vector<64x32xf32>, vector<4x32xf32> -> vector<4x32xf32>
    %c7_259 = arith.constant 7 : index
    %c0_260 = arith.constant 0 : index
    %c0_261 = arith.constant 0 : index
    %359 = vector.load %arg9[%c7_259, %c0_260, %c0_261] : memref<8x1x32xf32, #tpu.memory_space<vmem>>, vector<1x1x32xf32>
    %360 = vector.shape_cast %359 : vector<1x1x32xf32> to vector<1x32xf32>
    %361 = vector.broadcast %360 : vector<1x32xf32> to vector<4x32xf32>
    %362 = arith.addf %358, %361 : vector<4x32xf32>
    %c7_262 = arith.constant 7 : index
    %c0_263 = arith.constant 0 : index
    %c0_264 = arith.constant 0 : index
    %363 = vector.load %arg10[%c7_262, %c0_263, %c0_264] : memref<8x32x32xf32, #tpu.memory_space<vmem>>, vector<1x32x32xf32>
    %364 = vector.shape_cast %363 : vector<1x32x32xf32> to vector<32x32xf32>
    %cst_265 = arith.constant dense<0.000000e+00> : vector<4x32xf32>
    %365 = tpu.matmul %362, %364, %cst_265 {dimension_numbers = #tpu.dot_dimension_numbers<[1], [0], [0], [1], [0, 0, 1, 1], [], []>} : vector<4x32xf32>, vector<32x32xf32>, vector<4x32xf32> -> vector<4x32xf32>
    %c7_266 = arith.constant 7 : index
    %c0_267 = arith.constant 0 : index
    %c0_268 = arith.constant 0 : index
    %366 = vector.load %arg11[%c7_266, %c0_267, %c0_268] : memref<8x1x32xf32, #tpu.memory_space<vmem>>, vector<1x1x32xf32>
    %367 = vector.shape_cast %366 : vector<1x1x32xf32> to vector<1x32xf32>
    %368 = vector.broadcast %367 : vector<1x32xf32> to vector<4x32xf32>
    %369 = arith.addf %365, %368 : vector<4x32xf32>
    %cst_269 = arith.constant 0.000000e+00 : f32
    %370 = vector.broadcast %cst_269 : f32 to vector<4x32xf32>
    %371 = arith.maximumf %369, %370 : vector<4x32xf32>
    %c7_270 = arith.constant 7 : index
    %c0_271 = arith.constant 0 : index
    %c0_272 = arith.constant 0 : index
    %372 = vector.load %arg12[%c7_270, %c0_271, %c0_272] : memref<8x32x1xf32, #tpu.memory_space<vmem>>, vector<1x32x1xf32>
    %373 = vector.shape_cast %372 : vector<1x32x1xf32> to vector<32x1xf32>
    %cst_273 = arith.constant dense<0.000000e+00> : vector<4x1xf32>
    %374 = tpu.matmul %371, %373, %cst_273 {dimension_numbers = #tpu.dot_dimension_numbers<[1], [0], [0], [1], [0, 0, 1, 1], [], []>} : vector<4x32xf32>, vector<32x1xf32>, vector<4x1xf32> -> vector<4x1xf32>
    %c7_274 = arith.constant 7 : index
    %c0_275 = arith.constant 0 : index
    %c0_276 = arith.constant 0 : index
    %375 = vector.load %arg13[%c7_274, %c0_275, %c0_276] : memref<8x1x1xf32, #tpu.memory_space<vmem>>, vector<1x1x1xf32>
    %376 = vector.shape_cast %375 : vector<1x1x1xf32> to vector<1x1xf32>
    %377 = vector.broadcast %376 : vector<1x1xf32> to vector<4x1xf32>
    %378 = arith.addf %374, %377 : vector<4x1xf32>
    %cst_277 = arith.constant 0.000000e+00 : f32
    %379 = vector.broadcast %cst_277 : f32 to vector<4x1xf32>
    %380 = arith.subf %379, %378 : vector<4x1xf32>
    %381 = math.exp %380 : vector<4x1xf32>
    %cst_278 = arith.constant 1.000000e+00 : f32
    %382 = vector.broadcast %cst_278 : f32 to vector<4x1xf32>
    %383 = arith.addf %382, %381 : vector<4x1xf32>
    %cst_279 = arith.constant 1.000000e+00 : f32
    %384 = vector.broadcast %cst_279 : f32 to vector<4x1xf32>
    %385 = arith.divf %384, %383 : vector<4x1xf32>
    %c7_i32 = arith.constant 7 : i32
    %386 = vector.broadcast %c7_i32 : i32 to vector<4x8xi32>
    %387 = arith.cmpi eq, %23, %386 : vector<4x8xi32>
    %cst_280 = arith.constant 0.000000e+00 : f32
    %388 = vector.shape_cast %385 : vector<4x1xf32> to vector<4x1xf32>
    %389 = vector.broadcast %388 : vector<4x1xf32> to vector<4x8xf32>
    %390 = vector.broadcast %cst_280 : f32 to vector<4x8xf32>
    %391 = arith.select %387, %389, %390 : vector<4x8xi1>, vector<4x8xf32>
    %392 = arith.addf %346, %391 : vector<4x8xf32>
    %393 = tpu.iota {dimensions = array<i32: 1>} : vector<4x4xi32>
    %cst_281 = arith.constant 0.000000e+00 : f32
    %394 = vector.broadcast %cst_281 : f32 to vector<4x8xf32>
    %cst_282 = arith.constant 0.000000e+00 : f32
    %395 = vector.broadcast %cst_282 : f32 to vector<4x4xf32>
    %cst_283 = arith.constant dense<0xFF800000> : vector<4xf32>
    %396 = vector.multi_reduction <maximumf>, %21, %cst_283 [1] : vector<4x8xf32> to vector<4xf32>
    %397 = vector.shape_cast %396 : vector<4xf32> to vector<4x1xf32>
    %398 = vector.broadcast %397 : vector<4x1xf32> to vector<4x8xf32>
    %399 = arith.cmpf oeq, %21, %398 : vector<4x8xf32>
    %c8_i32 = arith.constant 8 : i32
    %400 = vector.broadcast %c8_i32 : i32 to vector<4x8xi32>
    %401 = arith.select %399, %23, %400 : vector<4x8xi1>, vector<4x8xi32>
    %cst_284 = arith.constant dense<2147483647> : vector<4xi32>
    %402 = vector.multi_reduction <minsi>, %401, %cst_284 [1] : vector<4x8xi32> to vector<4xi32>
    %403 = vector.shape_cast %402 : vector<4xi32> to vector<4x1xi32>
    %404 = vector.broadcast %403 : vector<4x1xi32> to vector<4x8xi32>
    %405 = arith.cmpi eq, %23, %404 : vector<4x8xi32>
    %406 = arith.extui %405 : vector<4x8xi1> to vector<4x8xi32>
    %407 = arith.sitofp %406 : vector<4x8xi32> to vector<4x8xf32>
    %408 = arith.addf %394, %407 : vector<4x8xf32>
    %409 = arith.mulf %407, %392 : vector<4x8xf32>
    %cst_285 = arith.constant dense<0.000000e+00> : vector<4xf32>
    %410 = vector.multi_reduction <add>, %409, %cst_285 [1] : vector<4x8xf32> to vector<4xf32>
    %411 = vector.shape_cast %410 : vector<4xf32> to vector<4x1xf32>
    %c0_i32_286 = arith.constant 0 : i32
    %412 = vector.broadcast %c0_i32_286 : i32 to vector<4x4xi32>
    %413 = arith.cmpi eq, %393, %412 : vector<4x4xi32>
    %cst_287 = arith.constant 0.000000e+00 : f32
    %414 = vector.shape_cast %411 : vector<4x1xf32> to vector<4x1xf32>
    %415 = vector.broadcast %414 : vector<4x1xf32> to vector<4x4xf32>
    %416 = vector.broadcast %cst_287 : f32 to vector<4x4xf32>
    %417 = arith.select %413, %415, %416 : vector<4x4xi1>, vector<4x4xf32>
    %418 = arith.addf %395, %417 : vector<4x4xf32>
    %cst_288 = arith.constant 0.000000e+00 : f32
    %419 = vector.broadcast %cst_288 : f32 to vector<4x8xf32>
    %420 = arith.cmpf ogt, %407, %419 : vector<4x8xf32>
    %cst_289 = arith.constant -1.000000e+00 : f32
    %421 = vector.broadcast %cst_289 : f32 to vector<4x8xf32>
    %422 = arith.select %420, %421, %21 : vector<4x8xi1>, vector<4x8xf32>
    %cst_290 = arith.constant dense<0xFF800000> : vector<4xf32>
    %423 = vector.multi_reduction <maximumf>, %422, %cst_290 [1] : vector<4x8xf32> to vector<4xf32>
    %424 = vector.shape_cast %423 : vector<4xf32> to vector<4x1xf32>
    %425 = vector.broadcast %424 : vector<4x1xf32> to vector<4x8xf32>
    %426 = arith.cmpf oeq, %422, %425 : vector<4x8xf32>
    %c8_i32_291 = arith.constant 8 : i32
    %427 = vector.broadcast %c8_i32_291 : i32 to vector<4x8xi32>
    %428 = arith.select %426, %23, %427 : vector<4x8xi1>, vector<4x8xi32>
    %cst_292 = arith.constant dense<2147483647> : vector<4xi32>
    %429 = vector.multi_reduction <minsi>, %428, %cst_292 [1] : vector<4x8xi32> to vector<4xi32>
    %430 = vector.shape_cast %429 : vector<4xi32> to vector<4x1xi32>
    %431 = vector.broadcast %430 : vector<4x1xi32> to vector<4x8xi32>
    %432 = arith.cmpi eq, %23, %431 : vector<4x8xi32>
    %433 = arith.extui %432 : vector<4x8xi1> to vector<4x8xi32>
    %434 = arith.sitofp %433 : vector<4x8xi32> to vector<4x8xf32>
    %435 = arith.addf %408, %434 : vector<4x8xf32>
    %436 = arith.mulf %434, %392 : vector<4x8xf32>
    %cst_293 = arith.constant dense<0.000000e+00> : vector<4xf32>
    %437 = vector.multi_reduction <add>, %436, %cst_293 [1] : vector<4x8xf32> to vector<4xf32>
    %438 = vector.shape_cast %437 : vector<4xf32> to vector<4x1xf32>
    %c1_i32_294 = arith.constant 1 : i32
    %439 = vector.broadcast %c1_i32_294 : i32 to vector<4x4xi32>
    %440 = arith.cmpi eq, %393, %439 : vector<4x4xi32>
    %cst_295 = arith.constant 0.000000e+00 : f32
    %441 = vector.shape_cast %438 : vector<4x1xf32> to vector<4x1xf32>
    %442 = vector.broadcast %441 : vector<4x1xf32> to vector<4x4xf32>
    %443 = vector.broadcast %cst_295 : f32 to vector<4x4xf32>
    %444 = arith.select %440, %442, %443 : vector<4x4xi1>, vector<4x4xf32>
    %445 = arith.addf %418, %444 : vector<4x4xf32>
    %cst_296 = arith.constant 0.000000e+00 : f32
    %446 = vector.broadcast %cst_296 : f32 to vector<4x8xf32>
    %447 = arith.cmpf ogt, %434, %446 : vector<4x8xf32>
    %cst_297 = arith.constant -1.000000e+00 : f32
    %448 = vector.broadcast %cst_297 : f32 to vector<4x8xf32>
    %449 = arith.select %447, %448, %422 : vector<4x8xi1>, vector<4x8xf32>
    %cst_298 = arith.constant dense<0xFF800000> : vector<4xf32>
    %450 = vector.multi_reduction <maximumf>, %449, %cst_298 [1] : vector<4x8xf32> to vector<4xf32>
    %451 = vector.shape_cast %450 : vector<4xf32> to vector<4x1xf32>
    %452 = vector.broadcast %451 : vector<4x1xf32> to vector<4x8xf32>
    %453 = arith.cmpf oeq, %449, %452 : vector<4x8xf32>
    %c8_i32_299 = arith.constant 8 : i32
    %454 = vector.broadcast %c8_i32_299 : i32 to vector<4x8xi32>
    %455 = arith.select %453, %23, %454 : vector<4x8xi1>, vector<4x8xi32>
    %cst_300 = arith.constant dense<2147483647> : vector<4xi32>
    %456 = vector.multi_reduction <minsi>, %455, %cst_300 [1] : vector<4x8xi32> to vector<4xi32>
    %457 = vector.shape_cast %456 : vector<4xi32> to vector<4x1xi32>
    %458 = vector.broadcast %457 : vector<4x1xi32> to vector<4x8xi32>
    %459 = arith.cmpi eq, %23, %458 : vector<4x8xi32>
    %460 = arith.extui %459 : vector<4x8xi1> to vector<4x8xi32>
    %461 = arith.sitofp %460 : vector<4x8xi32> to vector<4x8xf32>
    %462 = arith.addf %435, %461 : vector<4x8xf32>
    %463 = arith.mulf %461, %392 : vector<4x8xf32>
    %cst_301 = arith.constant dense<0.000000e+00> : vector<4xf32>
    %464 = vector.multi_reduction <add>, %463, %cst_301 [1] : vector<4x8xf32> to vector<4xf32>
    %465 = vector.shape_cast %464 : vector<4xf32> to vector<4x1xf32>
    %c2_i32_302 = arith.constant 2 : i32
    %466 = vector.broadcast %c2_i32_302 : i32 to vector<4x4xi32>
    %467 = arith.cmpi eq, %393, %466 : vector<4x4xi32>
    %cst_303 = arith.constant 0.000000e+00 : f32
    %468 = vector.shape_cast %465 : vector<4x1xf32> to vector<4x1xf32>
    %469 = vector.broadcast %468 : vector<4x1xf32> to vector<4x4xf32>
    %470 = vector.broadcast %cst_303 : f32 to vector<4x4xf32>
    %471 = arith.select %467, %469, %470 : vector<4x4xi1>, vector<4x4xf32>
    %472 = arith.addf %445, %471 : vector<4x4xf32>
    %cst_304 = arith.constant 0.000000e+00 : f32
    %473 = vector.broadcast %cst_304 : f32 to vector<4x8xf32>
    %474 = arith.cmpf ogt, %461, %473 : vector<4x8xf32>
    %cst_305 = arith.constant -1.000000e+00 : f32
    %475 = vector.broadcast %cst_305 : f32 to vector<4x8xf32>
    %476 = arith.select %474, %475, %449 : vector<4x8xi1>, vector<4x8xf32>
    %cst_306 = arith.constant dense<0xFF800000> : vector<4xf32>
    %477 = vector.multi_reduction <maximumf>, %476, %cst_306 [1] : vector<4x8xf32> to vector<4xf32>
    %478 = vector.shape_cast %477 : vector<4xf32> to vector<4x1xf32>
    %479 = vector.broadcast %478 : vector<4x1xf32> to vector<4x8xf32>
    %480 = arith.cmpf oeq, %476, %479 : vector<4x8xf32>
    %c8_i32_307 = arith.constant 8 : i32
    %481 = vector.broadcast %c8_i32_307 : i32 to vector<4x8xi32>
    %482 = arith.select %480, %23, %481 : vector<4x8xi1>, vector<4x8xi32>
    %cst_308 = arith.constant dense<2147483647> : vector<4xi32>
    %483 = vector.multi_reduction <minsi>, %482, %cst_308 [1] : vector<4x8xi32> to vector<4xi32>
    %484 = vector.shape_cast %483 : vector<4xi32> to vector<4x1xi32>
    %485 = vector.broadcast %484 : vector<4x1xi32> to vector<4x8xi32>
    %486 = arith.cmpi eq, %23, %485 : vector<4x8xi32>
    %487 = arith.extui %486 : vector<4x8xi1> to vector<4x8xi32>
    %488 = arith.sitofp %487 : vector<4x8xi32> to vector<4x8xf32>
    %489 = arith.addf %462, %488 : vector<4x8xf32>
    %490 = arith.mulf %488, %392 : vector<4x8xf32>
    %cst_309 = arith.constant dense<0.000000e+00> : vector<4xf32>
    %491 = vector.multi_reduction <add>, %490, %cst_309 [1] : vector<4x8xf32> to vector<4xf32>
    %492 = vector.shape_cast %491 : vector<4xf32> to vector<4x1xf32>
    %c3_i32_310 = arith.constant 3 : i32
    %493 = vector.broadcast %c3_i32_310 : i32 to vector<4x4xi32>
    %494 = arith.cmpi eq, %393, %493 : vector<4x4xi32>
    %cst_311 = arith.constant 0.000000e+00 : f32
    %495 = vector.shape_cast %492 : vector<4x1xf32> to vector<4x1xf32>
    %496 = vector.broadcast %495 : vector<4x1xf32> to vector<4x4xf32>
    %497 = vector.broadcast %cst_311 : f32 to vector<4x4xf32>
    %498 = arith.select %494, %496, %497 : vector<4x4xi1>, vector<4x4xf32>
    %499 = arith.addf %472, %498 : vector<4x4xf32>
    %c0_312 = arith.constant 0 : index
    %c0_313 = arith.constant 0 : index
    %500 = vector.load %arg16[%c0_312, %c0_313] : memref<4x4xf32, #tpu.memory_space<vmem>>, vector<4x4xf32>
    tpu.vector_store %arg16[%c0_312, %c0_313], %499 {strides = array<i32>} : memref<4x4xf32, #tpu.memory_space<vmem>>, vector<4x4xf32>,
    %501 = arith.mulf %21, %392 : vector<4x8xf32>
    %502 = arith.mulf %501, %489 : vector<4x8xf32>
    %cst_314 = arith.constant dense<0.000000e+00> : vector<4xf32>
    %503 = vector.multi_reduction <add>, %502, %cst_314 [1] : vector<4x8xf32> to vector<4xf32>
    %504 = vector.shape_cast %503 : vector<4xf32> to vector<4x1xf32>
    %cst_315 = arith.constant 9.99999997E-7 : f32
    %505 = vector.broadcast %cst_315 : f32 to vector<4x1xf32>
    %506 = arith.addf %504, %505 : vector<4x1xf32>
    %507 = vector.broadcast %506 : vector<4x1xf32> to vector<4x8xf32>
    %508 = arith.divf %502, %507 : vector<4x8xf32>
    %cst_316 = arith.constant 0.000000e+00 : f32
    %509 = vector.broadcast %cst_316 : f32 to vector<4x32xf32>
    %510 = vector.extract_strided_slice %508 {offsets = [0, 0], sizes = [4, 1], strides = [1, 1]} : vector<4x8xf32> to vector<4x1xf32>
    %511 = vector.broadcast %510 : vector<4x1xf32> to vector<4x32xf32>
    %512 = arith.mulf %511, %40 : vector<4x32xf32>
    %513 = arith.addf %509, %512 : vector<4x32xf32>
    %514 = vector.extract_strided_slice %508 {offsets = [0, 1], sizes = [4, 1], strides = [1, 1]} : vector<4x8xf32> to vector<4x1xf32>
    %515 = vector.broadcast %514 : vector<4x1xf32> to vector<4x32xf32>
    %516 = arith.mulf %515, %86 : vector<4x32xf32>
    %517 = arith.addf %513, %516 : vector<4x32xf32>
    %518 = vector.extract_strided_slice %508 {offsets = [0, 2], sizes = [4, 1], strides = [1, 1]} : vector<4x8xf32> to vector<4x1xf32>
    %519 = vector.broadcast %518 : vector<4x1xf32> to vector<4x32xf32>
    %520 = arith.mulf %519, %132 : vector<4x32xf32>
    %521 = arith.addf %517, %520 : vector<4x32xf32>
    %522 = vector.extract_strided_slice %508 {offsets = [0, 3], sizes = [4, 1], strides = [1, 1]} : vector<4x8xf32> to vector<4x1xf32>
    %523 = vector.broadcast %522 : vector<4x1xf32> to vector<4x32xf32>
    %524 = arith.mulf %523, %178 : vector<4x32xf32>
    %525 = arith.addf %521, %524 : vector<4x32xf32>
    %526 = vector.extract_strided_slice %508 {offsets = [0, 4], sizes = [4, 1], strides = [1, 1]} : vector<4x8xf32> to vector<4x1xf32>
    %527 = vector.broadcast %526 : vector<4x1xf32> to vector<4x32xf32>
    %528 = arith.mulf %527, %224 : vector<4x32xf32>
    %529 = arith.addf %525, %528 : vector<4x32xf32>
    %530 = vector.extract_strided_slice %508 {offsets = [0, 5], sizes = [4, 1], strides = [1, 1]} : vector<4x8xf32> to vector<4x1xf32>
    %531 = vector.broadcast %530 : vector<4x1xf32> to vector<4x32xf32>
    %532 = arith.mulf %531, %270 : vector<4x32xf32>
    %533 = arith.addf %529, %532 : vector<4x32xf32>
    %534 = vector.extract_strided_slice %508 {offsets = [0, 6], sizes = [4, 1], strides = [1, 1]} : vector<4x8xf32> to vector<4x1xf32>
    %535 = vector.broadcast %534 : vector<4x1xf32> to vector<4x32xf32>
    %536 = arith.mulf %535, %316 : vector<4x32xf32>
    %537 = arith.addf %533, %536 : vector<4x32xf32>
    %538 = vector.extract_strided_slice %508 {offsets = [0, 7], sizes = [4, 1], strides = [1, 1]} : vector<4x8xf32> to vector<4x1xf32>
    %539 = vector.broadcast %538 : vector<4x1xf32> to vector<4x32xf32>
    %540 = arith.mulf %539, %362 : vector<4x32xf32>
    %541 = arith.addf %537, %540 : vector<4x32xf32>
    %c0_317 = arith.constant 0 : index
    %c0_318 = arith.constant 0 : index
    %542 = vector.load %arg14[%c0_317, %c0_318] : memref<4x32xf32, #tpu.memory_space<vmem>>, vector<4x32xf32>
    tpu.vector_store %arg14[%c0_317, %c0_318], %541 {strides = array<i32>} : memref<4x32xf32, #tpu.memory_space<vmem>>, vector<4x32xf32>,
    return
  }
  func.func @transform_0(%arg0: i32) -> (i32, i32) {
    %c0_i32 = arith.constant 0 : i32
    %c0_i32_0 = arith.constant 0 : i32
    %c0_i32_1 = arith.constant 0 : i32
    return %c0_i32, %c0_i32_0 : i32, i32
  }
  func.func @transform_1(%arg0: i32) -> (i32, i32) {
    %c0_i32 = arith.constant 0 : i32
    %c0_i32_0 = arith.constant 0 : i32
    %c0_i32_1 = arith.constant 0 : i32
    return %c0_i32, %c0_i32_0 : i32, i32
  }
  func.func @transform_2(%arg0: i32) -> (i32, i32) {
    %c0_i32 = arith.constant 0 : i32
    %c0_i32_0 = arith.constant 0 : i32
    %c0_i32_1 = arith.constant 0 : i32
    return %c0_i32, %c0_i32_0 : i32, i32
  }
  func.func @transform_3(%arg0: i32) -> (i32, i32) {
    %c0_i32 = arith.constant 0 : i32
    %c0_i32_0 = arith.constant 0 : i32
    %c0_i32_1 = arith.constant 0 : i32
    return %c0_i32, %c0_i32_0 : i32, i32
  }
  func.func @transform_4(%arg0: i32) -> (i32, i32) {
    %c0_i32 = arith.constant 0 : i32
    %c0_i32_0 = arith.constant 0 : i32
    %c0_i32_1 = arith.constant 0 : i32
    return %c0_i32, %c0_i32_0 : i32, i32
  }
  func.func @transform_5(%arg0: i32) -> (i32, i32, i32) {
    %c0_i32 = arith.constant 0 : i32
    %c0_i32_0 = arith.constant 0 : i32
    %c0_i32_1 = arith.constant 0 : i32
    %c0_i32_2 = arith.constant 0 : i32
    return %c0_i32, %c0_i32_0, %c0_i32_1 : i32, i32, i32
  }
  func.func @transform_6(%arg0: i32) -> (i32, i32, i32) {
    %c0_i32 = arith.constant 0 : i32
    %c0_i32_0 = arith.constant 0 : i32
    %c0_i32_1 = arith.constant 0 : i32
    %c0_i32_2 = arith.constant 0 : i32
    return %c0_i32, %c0_i32_0, %c0_i32_1 : i32, i32, i32
  }
  func.func @transform_7(%arg0: i32) -> (i32, i32, i32) {
    %c0_i32 = arith.constant 0 : i32
    %c0_i32_0 = arith.constant 0 : i32
    %c0_i32_1 = arith.constant 0 : i32
    %c0_i32_2 = arith.constant 0 : i32
    return %c0_i32, %c0_i32_0, %c0_i32_1 : i32, i32, i32
  }
  func.func @transform_8(%arg0: i32) -> (i32, i32, i32) {
    %c0_i32 = arith.constant 0 : i32
    %c0_i32_0 = arith.constant 0 : i32
    %c0_i32_1 = arith.constant 0 : i32
    %c0_i32_2 = arith.constant 0 : i32
    return %c0_i32, %c0_i32_0, %c0_i32_1 : i32, i32, i32
  }
  func.func @transform_9(%arg0: i32) -> (i32, i32, i32) {
    %c0_i32 = arith.constant 0 : i32
    %c0_i32_0 = arith.constant 0 : i32
    %c0_i32_1 = arith.constant 0 : i32
    %c0_i32_2 = arith.constant 0 : i32
    return %c0_i32, %c0_i32_0, %c0_i32_1 : i32, i32, i32
  }
  func.func @transform_10(%arg0: i32) -> (i32, i32, i32) {
    %c0_i32 = arith.constant 0 : i32
    %c0_i32_0 = arith.constant 0 : i32
    %c0_i32_1 = arith.constant 0 : i32
    %c0_i32_2 = arith.constant 0 : i32
    return %c0_i32, %c0_i32_0, %c0_i32_1 : i32, i32, i32
  }
  func.func @transform_11(%arg0: i32) -> (i32, i32, i32) {
    %c0_i32 = arith.constant 0 : i32
    %c0_i32_0 = arith.constant 0 : i32
    %c0_i32_1 = arith.constant 0 : i32
    %c0_i32_2 = arith.constant 0 : i32
    return %c0_i32, %c0_i32_0, %c0_i32_1 : i32, i32, i32
  }
  func.func @transform_12(%arg0: i32) -> (i32, i32, i32) {
    %c0_i32 = arith.constant 0 : i32
    %c0_i32_0 = arith.constant 0 : i32
    %c0_i32_1 = arith.constant 0 : i32
    %c0_i32_2 = arith.constant 0 : i32
    return %c0_i32, %c0_i32_0, %c0_i32_1 : i32, i32, i32
  }
  func.func @transform_13(%arg0: i32) -> (i32, i32) {
    %c0_i32 = arith.constant 0 : i32
    %c0_i32_0 = arith.constant 0 : i32
    %c0_i32_1 = arith.constant 0 : i32
    return %c0_i32, %c0_i32_0 : i32, i32
  }
  func.func @transform_14(%arg0: i32) -> (i32, i32) {
    %c0_i32 = arith.constant 0 : i32
    %c0_i32_0 = arith.constant 0 : i32
    %c0_i32_1 = arith.constant 0 : i32
    return %c0_i32, %c0_i32_0 : i32, i32
  }
  func.func @transform_15(%arg0: i32) -> (i32, i32) {
    %c0_i32 = arith.constant 0 : i32
    %c0_i32_0 = arith.constant 0 : i32
    %c0_i32_1 = arith.constant 0 : i32
    return %c0_i32, %c0_i32_0 : i32, i32
  }
}

</mosaic_0001>

<bundles_post_ra>
// kernel: tpu_custom_call.1
= control target key start
LH: loop header
LB: loop body
LE: loop exit
PB: predicated region body
PF: predicated region fallthrough
CT: control target
= control target key end

     0   :  { %21 = vsyncpa [#allocation3], 0  ;;  %v4630_v3 = vmov 0.0|0.0   ;;  %vm4631_vm0 = vmmov 0   ;;  %v4632_v6 = vmov 0.0   ;;  %s5716_s0 = inlined_call_operand.vmem [shape: f32[4,32], index: 0, kind: input, shape index: {}]   ;;  %s5717_s1 = inlined_call_operand.vmem [shape: f32[32,64], index: 1, kind: input, shape index: {}]   ;;  %s5718_s2 = inlined_call_operand.vmem [shape: f32[1,64], index: 2, kind: input, shape index: {}]   ;;  %s5719_s3 = inlined_call_operand.vmem [shape: f32[64,8], index: 3, kind: input, shape index: {}]   ;;  %s5720_s4 = inlined_call_operand.vmem [shape: f32[1,8], index: 4, kind: input, shape index: {}]   ;;  %s5721_s5 = inlined_call_operand.vmem [shape: f32[8,32,64], index: 5, kind: input, shape index: {}]   ;;  %s5722_s6 = inlined_call_operand.vmem [shape: f32[8,1,64], index: 6, kind: input, shape index: {}]   ;;  %s5723_s7 = inlined_call_operand.vmem [shape: f32[8,64,32], index: 7, kind: input, shape index: {}]   ;;  %s5724_s8 = inlined_call_operand.vmem [shape: f32[8,1,32], index: 8, kind: input, shape index: {}]   ;;  %s5725_s9 = inlined_call_operand.vmem [shape: f32[8,32,32], index: 9, kind: input, shape index: {}]   ;;  %s5726_s10 = inlined_call_operand.vmem [shape: f32[8,1,32], index: 10, kind: input, shape index: {}]   ;;  %s5727_s11 = inlined_call_operand.vmem [shape: f32[8,32,1], index: 11, kind: input, shape index: {}]   ;;  %s5728_s12 = inlined_call_operand.vmem [shape: f32[8,1,1], index: 12, kind: input, shape index: {}]   ;;  %s5729_s13 = inlined_call_operand.hbm [shape: f32[4,32], index: 13, kind: output, shape index: {0}]   ;;  %s5730_s14 = inlined_call_operand.hbm [shape: f32[4,8], index: 14, kind: output, shape index: {1}]   ;;  %s5731_s15 = inlined_call_operand.hbm [shape: f32[4,4], index: 15, kind: output, shape index: {2}]  }
   0x1   :  { %v50_v0 = vld [vmem:[%s5717_s1] sm:$0xff]  ;;  %v51_v1 = vld [vmem:[%s5717_s1 + $0x8] sm:$0xff]  ;;  %v52_v2 = vld [vmem:[%s5717_s1 + $0x10] sm:$0xff]  ;;  %4240 = vmatprep.subr.bf16.mxu0 %v4630_v3  ;;  %3802 = vmatprep.mubr.msk.f32.mxu0 %vm4631_vm0, %v4632_v6 }
   0x2   :  { %v4241_v4 = vpack.c.bf16 %v51_v1, %v50_v0  ;;  %v53_v5 = vld [vmem:[%s5717_s1 + $0x18] sm:$0xff]  ;;  %4246 = vmatprep.subr.bf16.mxu1 %v4630_v3  ;;  %3821 = vmatprep.mubr.msk.f32.mxu1 %vm4631_vm0, %v4632_v6  ;;  %v136_v8 = vld [vmem:[%s5719_s3] sm:$0xff]  ;;  %v137_v9 = vld [vmem:[%s5719_s3 + $0x8] sm:$0xff] }
   0x3   :  { %v4244_v7 = vpack.c.bf16 %v53_v5, %v52_v2  ;;  %v138_v10 = vld [vmem:[%s5719_s3 + $0x10] sm:$0xff]  ;;  %v240_v11 = vld [vmem:[%s5721_s5] sm:$0xff]  ;;  %v241_v12 = vld [vmem:[%s5721_s5 + $0x8] sm:$0xff]  ;;  %v4247_v13 = vpack.c.bf16 %v137_v9, %v136_v8 }
   0x4   :  { %4242 = vmatpush3.bf16.msra.mxu0 %v4241_v4  ;;  %v139_v14 = vld [vmem:[%s5719_s3 + $0x18] sm:$0xff] }
   0x5   :  { %4243 = vmatprep.subr.bf16.mxu0 %v4630_v3  ;;  %4248 = vmatpush3.bf16.msra.mxu1 %v4247_v13  ;;  %v4250_v15 = vpack.c.bf16 %v139_v14, %v138_v10 }
   0x6   :  { %22 = vsyncpa [#allocation5], 0  ;;  %v4764_v16 = vld [vmem:[%s5716_s0] sm:$0xf]  ;;  %vm61_vm1 = vcmask 261120   ;;  %v4259_v17 = vpack.c.bf16 %v241_v12, %v240_v11  ;;  %4249 = vmatprep.subr.bf16.mxu1 %v4630_v3  ;;  %v141_v19 = vld [vmem:[%s5719_s3 + $0x28] sm:$0xff] }
   0x7   :  { %v140_v18 = vld [vmem:[%s5719_s3 + $0x20] sm:$0xff]  ;;  %v242_v20 = vld [vmem:[%s5721_s5 + $0x10] sm:$0xff]  ;;  %v243_v21 = vld [vmem:[%s5721_s5 + $0x18] sm:$0xff]  ;;  %vm151_vm2 = vcmask 523264   ;;  %vm225_vm3 = vcmask 60416  }
   0x8   :  { %4245 = vmatpush3.bf16.msra.mxu0 %v4244_v7  ;;  %v4253_v22 = vpack.c.bf16 %v141_v19, %v140_v18  ;;  %v4262_v23 = vpack.c.bf16 %v243_v21, %v242_v20  ;;  %v322_v24 = vld [vmem:[%s5723_s7] sm:$0xff]  ;;  %v323_v25 = vld [vmem:[%s5723_s7 + $0x8] sm:$0xff]  ;;  %v142_v27 = vld [vmem:[%s5719_s3 + $0x30] sm:$0xff] }
   0x9   :  { %4258 = vmatprep.subr.bf16.mxu0 %v4630_v3  ;;  %4251 = vmatpush3.bf16.msra.mxu1 %v4250_v15  ;;  %v4265_v26 = vpack.c.bf16 %v323_v25, %v322_v24  ;;  %v143_v28 = vld [vmem:[%s5719_s3 + $0x38] sm:$0xff]  ;;  %v324_v29 = vld [vmem:[%s5723_s7 + $0x10] sm:$0xff]  ;;  %v326_v33 = vld [vmem:[%s5723_s7 + $0x20] sm:$0xff] }
   0xa   :  { %4252 = vmatprep.subr.bf16.mxu1 %v4630_v3  ;;  %v4256_v30 = vpack.c.bf16 %v143_v28, %v142_v27  ;;  %v325_v31 = vld [vmem:[%s5723_s7 + $0x18] sm:$0xff]  ;;  %v327_v34 = vld [vmem:[%s5723_s7 + $0x28] sm:$0xff]  ;;  %v328_v36 = vld [vmem:[%s5723_s7 + $0x30] sm:$0xff] }
   0xb   :  { %3803 = vmatmul.mubr.msk.f32.vlgmr.msra.gmra.mrb[0].mxu0 %vm61_vm1, %v4764_v16  ;;  %v4268_v32 = vpack.c.bf16 %v325_v31, %v324_v29  ;;  %v4271_v35 = vpack.c.bf16 %v327_v34, %v326_v33  ;;  %v329_v37 = vld [vmem:[%s5723_s7 + $0x38] sm:$0xff]  ;;  %v3348_v39 = vld [vmem:[%s5718_s2] ss:$0 sm:$0xff]  ;;  %v411_v50 = vld [vmem:[%s5725_s9 + $0x8] sm:$0xff] }
   0xc   :  { %4260 = vmatpush3.bf16.msra.mxu0 %v4259_v17  ;;  %3832 = vmatprep.mubr.msk.f32.mxu0 %vm4631_vm0, %v4632_v6  ;;  %v4274_v38 = vpack.c.bf16 %v329_v37, %v328_v36  ;;  %v3352_v44 = vld [vmem:[%s5722_s6] ss:$0 sm:$0xff]  ;;  %v412_v52 = vld [vmem:[%s5725_s9 + $0x10] sm:$0xff]  ;;  %v413_v53 = vld [vmem:[%s5725_s9 + $0x18] sm:$0xff] }
   0xd   :  { %4261 = vmatprep.subr.bf16.mxu0 %v4630_v3  ;;  %4254 = vmatpush3.bf16.msra.mxu1 %v4253_v22  ;;  %v410_v49 = vld [vmem:[%s5725_s9] sm:$0xff]  ;;  %v4280_v54 = vpack.c.bf16 %v413_v53, %v412_v52  ;;  %v3361_v56 = vld [vmem:[%s5721_s5 + $0x28] sm:$0xff]  ;;  %v3362_v57 = vld [vmem:[%s5721_s5 + $0x30] sm:$0xff] }
   0xe   :  { %4255 = vmatprep.subr.bf16.mxu1 %v4630_v3  ;;  %v4277_v51 = vpack.c.bf16 %v411_v50, %v410_v49  ;;  %v3360_v55 = vld [vmem:[%s5721_s5 + $0x20] sm:$0xff]  ;;  %v3363_v59 = vld [vmem:[%s5721_s5 + $0x38] sm:$0xff]  ;;  %v496_v9 = vld [vmem:[%s5727_s11 + $0x8] sm:$0xff] }
   0xf   :  { %v4289_v58 = vpack.c.bf16 %v3361_v56, %v3360_v55  ;;  %v4292_v60 = vpack.c.bf16 %v3363_v59, %v3362_v57  ;;  %v3350_v61 = vld [vmem:[%s5720_s4] ss:$0 sm:$0xff]  ;;  %v497_v11 = vld [vmem:[%s5727_s11 + $0x10] sm:$0xff]  ;;  %v498_v12 = vld [vmem:[%s5727_s11 + $0x18] sm:$0xff] }
  0x10   :  { %4263 = vmatpush3.bf16.msra.mxu0 %v4262_v23  ;;  %v3354_v2 = vld [vmem:[%s5724_s8] ss:$0 sm:$0xff]  ;;  %v4286_v13 = vpack.c.bf16 %v498_v12, %v497_v11  ;;  %v3368_v24 = vld [vmem:[%s5723_s7 + $0x48] sm:$0xff]  ;;  %v3370_v31 = vld [vmem:[%s5723_s7 + $0x58] sm:$0xff] }
  0x11   :  { %4264 = vmatprep.subr.bf16.mxu0 %v4630_v3  ;;  %4257 = vmatpush3.bf16.msra.mxu1 %v4256_v30  ;;  %v495_v8 = vld [vmem:[%s5727_s11] sm:$0xff]  ;;  %v3369_v30 = vld [vmem:[%s5723_s7 + $0x50] sm:$0xff]  ;;  %v3372_v34 = vld [vmem:[%s5723_s7 + $0x68] sm:$0xff] }
  0x12   :  { %4276 = vmatprep.subr.bf16.mxu1 %v4630_v3  ;;  %v4283_v10 = vpack.c.bf16 %v496_v9, %v495_v8  ;;  %v3356_v22 = vld [vmem:[%s5726_s10] ss:$0 sm:$0xff]  ;;  %v3365_v36 = vld [vmem:[%s5722_s6 + $0x1] ss:$0 sm:$0xff]  ;;  %v3373_v37 = vld [vmem:[%s5723_s7 + $0x70] sm:$0xff] }
  0x13   :  { %3833 = vmatmul.mubr.msk.f32.vlgmr.msra.gmra.mrb[2].mxu0 %vm61_vm1, %v4764_v16  ;;  %v3367_v23 = vld [vmem:[%s5723_s7 + $0x40] sm:$0xff]  ;;  %v3380_v49 = vld [vmem:[%s5725_s9 + $0x30] sm:$0xff]  ;;  %v3381_v50 = vld [vmem:[%s5725_s9 + $0x38] sm:$0xff] }
  0x14   :  { %4266 = vmatpush3.bf16.msra.mxu0 %v4265_v26  ;;  %3851 = vmatprep.mubr.msk.f32.mxu0 %vm4631_vm0, %v4632_v6  ;;  %v4295_v28 = vpack.c.bf16 %v3368_v24, %v3367_v23  ;;  %v3371_v33 = vld [vmem:[%s5723_s7 + $0x60] sm:$0xff]  ;;  %v3393_v53 = vld [vmem:[%s5721_s5 + $0x48] sm:$0xff]  ;;  %v3394_v55 = vld [vmem:[%s5721_s5 + $0x50] sm:$0xff] }
  0x15   :  { %4267 = vmatprep.subr.bf16.mxu0 %v4630_v3  ;;  %v3392_v52 = vld [vmem:[%s5721_s5 + $0x40] sm:$0xff]  ;;  %v3395_v56 = vld [vmem:[%s5721_s5 + $0x58] sm:$0xff]  ;;  %v3386_v11 = vld [vmem:[%s5727_s11 + $0x28] sm:$0xff] }
  0x16   :  { %v4322_v57 = vpack.c.bf16 %v3395_v56, %v3394_v55  ;;  %v3383_v23 = vld [vmem:[%s5726_s10 + $0x1] ss:$0 sm:$0xff]  ;;  %v3412_v55 = vld [vmem:[%s5725_s9 + $0x50] sm:$0xff]  ;;  %v3413_v56 = vld [vmem:[%s5725_s9 + $0x58] sm:$0xff] }
  0x17   :  { %v3399_v24 = vld [vmem:[%s5723_s7 + $0x80] sm:$0xff] }
  0x18   :  { %4269 = vmatpush3.bf16.msra.mxu0 %v4268_v32  ;;  %v4298_v32 = vpack.c.bf16 %v3370_v31, %v3369_v30  ;;  %v3401_v31 = vld [vmem:[%s5723_s7 + $0x90] sm:$0xff] }
  0x19   :  { %4270 = vmatprep.subr.bf16.mxu0 %v4630_v3 }
  0x1c   :  { %4272 = vmatpush3.bf16.msra.mxu0 %v4271_v35  ;;  %v4301_v35 = vpack.c.bf16 %v3372_v34, %v3371_v33  ;;  %v3403_v34 = vld [vmem:[%s5723_s7 + $0xa0] sm:$0xff] }
  0x1d   :  { %4273 = vmatprep.subr.bf16.mxu0 %v4630_v3 }
  0x20   :  { %4275 = vmatpush3.bf16.msra.mxu0 %v4274_v38  ;;  %v3374_v38 = vld [vmem:[%s5723_s7 + $0x78] sm:$0xff] }
  0x21   :  { %4288 = vmatprep.subr.bf16.mxu0 %v4630_v3 }
  0xde   :  { %v131_v40 = vpop.f32.mrb[0].mxu0 }
  0xdf   :  { %v132_v41 = vadd.f32 %v3348_v39, %v131_v40  ;;  %v3804_v42 = vpop.f32.mrb[1].mxu0  ;;  %v4304_v40 = vpack.c.bf16 %v3374_v38, %v3373_v37  ;;  %v3397_v37 = vld [vmem:[%s5722_s6 + $0x2] ss:$0 sm:$0xff]  ;;  %v3405_v38 = vld [vmem:[%s5723_s7 + $0xb0] sm:$0xff] }
  0xe1   :  { %v135_v43 = vmax.f32 %v132_v41, 0.0 }
  0xe3   :  { %3822 = vmatmul.mubr.msk.f32.vlgmr.msra.gmra.mrb[0].mxu1 %vm151_vm2, %v135_v43 }
  0xe4   :  { %3862 = vmatprep.mubr.msk.f32.mxu1 %vm4631_vm0, %v4632_v6  ;;  %4278 = vmatpush3.bf16.msra.mxu1 %v4277_v51  ;;  %v4310_v51 = vpack.c.bf16 %v3381_v50, %v3380_v49 }
  0xe5   :  { %4279 = vmatprep.subr.bf16.mxu1 %v4630_v3 }
  0xe6   :  { %v317_v45 = vpop.f32.mrb[2].mxu0 }
  0xe7   :  { %v318_v46 = vadd.f32 %v3352_v44, %v317_v45  ;;  %v3834_v47 = vpop.f32.mrb[3].mxu0 }
  0xe8   :  { %4281 = vmatpush3.bf16.msra.mxu1 %v4280_v54  ;;  %v3379_v47 = vld [vmem:[%s5725_s9 + $0x28] sm:$0xff]  ;;  %v4319_v54 = vpack.c.bf16 %v3393_v53, %v3392_v52  ;;  %v3410_v52 = vld [vmem:[%s5725_s9 + $0x40] sm:$0xff] }
  0xe9   :  { %v321_v48 = vmax.f32 %v318_v46, 0.0  ;;  %4282 = vmatprep.subr.bf16.mxu1 %v4630_v3  ;;  %v3378_v46 = vld [vmem:[%s5725_s9 + $0x20] sm:$0xff]  ;;  %v3411_v53 = vld [vmem:[%s5725_s9 + $0x48] sm:$0xff] }
  0xeb   :  { %3852 = vmatmul.mubr.msk.f32.vlgmr.msra.gmra.mrb[4].mxu0 %vm151_vm2, %v321_v48  ;;  %v4307_v48 = vpack.c.bf16 %v3379_v47, %v3378_v46 }
  0xec   :  { %3884 = vmatprep.mubr.msk.f32.mxu0 %vm4631_vm0, %v4632_v6  ;;  %4290 = vmatpush3.bf16.msra.mxu0 %v4289_v58 }
  0xed   :  { %4291 = vmatprep.subr.bf16.mxu0 %v4630_v3 }
  0xf0   :  { %4293 = vmatpush3.bf16.msra.mxu0 %v4292_v60  ;;  %v3376_v60 = vld [vmem:[%s5724_s8 + $0x1] ss:$0 sm:$0xff] }
  0xf1   :  { %4306 = vmatprep.subr.bf16.mxu0 %v4630_v3 }
  0xf3   :  { %3885 = vmatmul.mubr.msk.f32.vlgmr.msra.gmra.mrb[6].mxu0 %vm61_vm1, %v4764_v16 }
  0xf4   :  { %3914 = vmatprep.mubr.msk.f32.mxu0 %vm4631_vm0, %v4632_v6  ;;  %4308 = vmatpush3.bf16.msra.mxu0 %v4307_v48 }
  0xf5   :  { %4309 = vmatprep.subr.bf16.mxu0 %v4630_v3 }
  0xf8   :  { %4311 = vmatpush3.bf16.msra.mxu0 %v4310_v51 }
  0xf9   :  { %4312 = vmatprep.subr.bf16.mxu0 %v4630_v3 }
 0x1b6   :  { %v221_v62 = vpop.f32.mrb[0].mxu1 }
 0x1b7   :  { %v222_v63 = vadd.f32 %v3350_v61, %v221_v62  ;;  %v3823_v0 = vpop.f32.mrb[1].mxu1  ;;  %v238_v61 = vlaneseq }
 0x1b9   :  { %v226_v1 = vsel %vm225_vm3, %v222_v63, -inf }
 0x1ba   :  { %227 = vmax.xlane.f32.xlu0 %v226_v1  ;;  %v4986_v1 = vand.u32 127, %v238_v61 }
 0x1be   :  { %v406_v4 = vpop.f32.mrb[4].mxu0 }
 0x1bf   :  { %v4878_v5 = vadd.f32 %v3354_v2, %v406_v4  ;;  %v3853_v7 = vpop.f32.mrb[5].mxu0 }
 0x1c1   :  { %3863 = vmatmul.mubr.msk.f32.vlgmr.msra.gmra.mrb[2].mxu1 %vm61_vm1, %v4878_v5 }
 0x1c2   :  { %3873 = vmatprep.mubr.msk.f32.mxu1 %vm4631_vm0, %v4632_v6  ;;  %4284 = vmatpush3.bf16.msra.mxu1 %v4283_v10  ;;  %v3385_v10 = vld [vmem:[%s5727_s11 + $0x20] sm:$0xff] }
 0x1c3   :  { %4285 = vmatprep.subr.bf16.mxu1 %v4630_v3  ;;  %v4313_v12 = vpack.c.bf16 %v3386_v11, %v3385_v10 }
 0x1c6   :  { %4287 = vmatpush3.bf16.msra.mxu1 %v4286_v13  ;;  %v672_v14 = vpop.f32.mrb[6].mxu0  ;;  %v3387_v13 = vld [vmem:[%s5727_s11 + $0x30] sm:$0xff] }
 0x1c7   :  { %4294 = vmatprep.subr.bf16.mxu1 %v4630_v3  ;;  %v3886_v15 = vpop.f32.mrb[7].mxu0  ;;  %v673_v39 = vadd.f32 %v3365_v36, %v672_v14  ;;  %v3388_v14 = vld [vmem:[%s5727_s11 + $0x38] sm:$0xff] }
 0x1c8   :  { %v4316_v15 = vpack.c.bf16 %v3388_v14, %v3387_v13 }
 0x1c9   :  { %v676_v41 = vmax.f32 %v673_v39, 0.0  ;;  %v3406_v39 = vld [vmem:[%s5723_s7 + $0xb8] sm:$0xff] }
 0x247   :  { %v228_v17 = vpop.xlane.xlu0 %227 }
 0x248   :  { %v229_v18 = vsub.f32 %v222_v63, %v228_v17 }
 0x24a   :  { %v230_v19 = vmul.f32 1.442695, %v229_v18 }
 0x24c   :  { %4521 = vpow2.f32 %v230_v19 }
 0x256   :  { %v4522_v20 = vpop.eup %4521 }
 0x257   :  { %v232_v21 = vsel %vm225_vm3, %v4522_v20, 0.0 }
 0x258   :  { %233 = vadd.xlane.f32.xlu0 %v232_v21 }
 0x294   :  { %v490_v25 = vpop.f32.mrb[2].mxu1 }
 0x295   :  { %v491_v26 = vadd.f32 %v3356_v22, %v490_v25  ;;  %v3864_v27 = vpop.f32.mrb[3].mxu1  ;;  %v3400_v25 = vld [vmem:[%s5723_s7 + $0x88] sm:$0xff] }
 0x297   :  { %v494_v29 = vmax.f32 %v491_v26, 0.0 }
 0x299   :  { %3874 = vmatmul.mubr.msk.f32.vlgmr.msra.gmra.mrb[4].mxu1 %vm61_vm1, %v494_v29  ;;  %v4325_v29 = vpack.c.bf16 %v3400_v25, %v3399_v24 }
 0x29a   :  { %4296 = vmatpush3.bf16.msra.mxu1 %v4295_v28  ;;  %3903 = vmatprep.mubr.msk.f32.mxu1 %vm4631_vm0, %v4632_v6 }
 0x29b   :  { %4297 = vmatprep.subr.bf16.mxu1 %v4630_v3 }
 0x29e   :  { %4299 = vmatpush3.bf16.msra.mxu1 %v4298_v32  ;;  %v3402_v32 = vld [vmem:[%s5723_s7 + $0x98] sm:$0xff] }
 0x29f   :  { %4300 = vmatprep.subr.bf16.mxu1 %v4630_v3  ;;  %v4328_v33 = vpack.c.bf16 %v3402_v32, %v3401_v31  ;;  %v3431_v31 = vld [vmem:[%s5723_s7 + $0xc0] sm:$0xff]  ;;  %v3432_v32 = vld [vmem:[%s5723_s7 + $0xc8] sm:$0xff] }
 0x2a2   :  { %4302 = vmatpush3.bf16.msra.mxu1 %v4301_v35  ;;  %v3404_v35 = vld [vmem:[%s5723_s7 + $0xa8] sm:$0xff] }
 0x2a3   :  { %4303 = vmatprep.subr.bf16.mxu1 %v4630_v3  ;;  %v4331_v36 = vpack.c.bf16 %v3404_v35, %v3403_v34 }
 0x2a6   :  { %4305 = vmatpush3.bf16.msra.mxu1 %v4304_v40 }
 0x2a7   :  { %4318 = vmatprep.subr.bf16.mxu1 %v4630_v3 }
 0x2a9   :  { %3904 = vmatmul.mubr.msk.f32.vlgmr.msra.gmra.mrb[6].mxu1 %vm151_vm2, %v676_v41  ;;  %v4334_v41 = vpack.c.bf16 %v3406_v39, %v3405_v38  ;;  %v3433_v38 = vld [vmem:[%s5723_s7 + $0xd0] sm:$0xff]  ;;  %v3434_v39 = vld [vmem:[%s5723_s7 + $0xd8] sm:$0xff] }
 0x2aa   :  { %3936 = vmatprep.mubr.msk.f32.mxu1 %vm4631_vm0, %v4632_v6  ;;  %4320 = vmatpush3.bf16.msra.mxu1 %v4319_v54  ;;  %v4337_v54 = vpack.c.bf16 %v3411_v53, %v3410_v52 }
 0x2ab   :  { %4321 = vmatprep.subr.bf16.mxu1 %v4630_v3 }
 0x2ae   :  { %4323 = vmatpush3.bf16.msra.mxu1 %v4322_v57  ;;  %v4340_v57 = vpack.c.bf16 %v3413_v56, %v3412_v55 }
 0x2af   :  { %4336 = vmatprep.subr.bf16.mxu1 %v4630_v3 }
 0x2b1   :  { %3937 = vmatmul.mubr.msk.f32.vlgmr.msra.gmra.mrb[8].mxu1 %vm61_vm1, %v4764_v16 }
 0x2b2   :  { %3966 = vmatprep.mubr.msk.f32.mxu1 %vm4631_vm0, %v4632_v6  ;;  %4338 = vmatpush3.bf16.msra.mxu1 %v4337_v54 }
 0x2b3   :  { %4339 = vmatprep.subr.bf16.mxu1 %v4630_v3 }
 0x2b6   :  { %4341 = vmatpush3.bf16.msra.mxu1 %v4340_v57 }
 0x2b7   :  { %4342 = vmatprep.subr.bf16.mxu1 %v4630_v3 }
 0x2e5   :  { %v234_v42 = vpop.xlane.xlu0 %233 }
 0x2e6   :  { %4523 = vrcp.f32 %v234_v42 }
 0x2f0   :  { %v4524_v43 = vpop.eup %4523 }
 0x2f1   :  { %v4939_v44 = vmul.f32 %v4524_v43, %v4522_v20 }
 0x2f3   :  { %237 = vst.msk [vmem:[#allocation4] sm:$0xf] %vm225_vm3, %v4939_v44  ;;  %v3120_v45 = vsel %vm225_vm3, %v4939_v44, -inf }
 0x2f4   :  { %3121 = vmax.xlane.f32.xlu1 %v3120_v45 }
 0x36c   :  { %v4977_v58 = vpop.f32.mrb[4].mxu1 }
 0x36d   :  { %v3875_v59 = vpop.f32.mrb[5].mxu1 }
 0x36e   :  { %v3424_v59 = vld [vmem:[%s5721_s5 + $0x60] sm:$0xff] }
 0x37c   :  { %v763_v62 = vpop.f32.mrb[6].mxu1 }
 0x37d   :  { %v4982_v63 = vadd.f32 %v3376_v60, %v763_v62  ;;  %v3905_v0 = vpop.f32.mrb[7].mxu1  ;;  %v3425_v60 = vld [vmem:[%s5721_s5 + $0x68] sm:$0xff]  ;;  %v3426_v62 = vld [vmem:[%s5721_s5 + $0x70] sm:$0xff] }
 0x37e   :  { %v4349_v61 = vpack.c.bf16 %v3425_v60, %v3424_v59  ;;  %v3427_v0 = vld [vmem:[%s5721_s5 + $0x78] sm:$0xff] }
 0x37f   :  { %3915 = vmatmul.mubr.msk.f32.vlgmr.msra.gmra.mrb[8].mxu0 %vm61_vm1, %v4982_v63 }
 0x380   :  { %3925 = vmatprep.mubr.msk.f32.mxu0 %vm4631_vm0, %v4632_v6  ;;  %4314 = vmatpush3.bf16.msra.mxu0 %v4313_v12 }
 0x381   :  { %v3122_v2 = vpop.xlane.xlu1 %3121  ;;  %4315 = vmatprep.subr.bf16.mxu0 %v4630_v3 }
 0x382   :  { %vm3123_vm4 = vcmp.eq.f32.partialorder %v4939_v44, %v3122_v2  ;;  %v4352_v2 = vpack.c.bf16 %v3427_v0, %v3426_v62  ;;  %v3442_v62 = vld [vmem:[%s5725_s9 + $0x60] sm:$0xff]  ;;  %v3443_v0 = vld [vmem:[%s5725_s9 + $0x68] sm:$0xff] }
 0x383   :  { %v3124_v4 = vsel %vm3123_vm4, %v4986_v1, 8 }
 0x384   :  { %v3125_v7 = vsel %vm225_vm3, %v3124_v4, 2147483647  ;;  %4317 = vmatpush3.bf16.msra.mxu0 %v4316_v15  ;;  %v1033_v17 = vpop.f32.mrb[8].mxu1 }
 0x385   :  { %v3127_v8 = vshra.s32 %v3125_v7, 16  ;;  %4324 = vmatprep.subr.bf16.mxu0 %v4630_v3  ;;  %v3938_v18 = vpop.f32.mrb[9].mxu1  ;;  %v3126_v19 = vand.u32 65535, %v3125_v7  ;;  %v1034_v40 = vadd.f32 %v3397_v37, %v1033_v17 }
 0x386   :  { %v3417_v18 = vld [vmem:[%s5727_s11 + $0x40] sm:$0xff] }
 0x387   :  { %v3129_v9 = vcvt.s32.f32 %v3127_v8  ;;  %v3128_v21 = vcvt.s32.f32 %v3126_v19  ;;  %v1037_v42 = vmax.f32 %v1034_v40, 0.0  ;;  %v3408_v8 = vld [vmem:[%s5724_s8 + $0x2] ss:$0 sm:$0xff]  ;;  %v3418_v19 = vld [vmem:[%s5727_s11 + $0x48] sm:$0xff]  ;;  %v4358_v40 = vpack.c.bf16 %v3434_v39, %v3433_v38 }
 0x389   :  { %3130 = vmin.xlane.f32.xlu1 %v3129_v9 }
 0x416   :  { %v3131_v20 = vpop.xlane.xlu1 %3130 }
 0x417   :  { %vm3132_vm5 = vcmp.eq.f32.partialorder %v3129_v9, %v3131_v20  ;;  %v3137_v43 = vcvt.f32.s32 %v3131_v20  ;;  %v4343_v20 = vpack.c.bf16 %v3418_v19, %v3417_v18  ;;  %v3440_v19 = vld [vmem:[%s5724_s8 + $0x3] ss:$0 sm:$0xff] }
 0x418   :  { %v3133_v22 = vsel %vm3132_vm5, %v3128_v21, inf  ;;  %v3419_v21 = vld [vmem:[%s5727_s11 + $0x50] sm:$0xff] }
 0x419   :  { %3134 = vmin.xlane.f32.xlu0 %v3133_v22  ;;  %v3138_v46 = vshll.u32 %v3137_v43, 16  ;;  %v3420_v22 = vld [vmem:[%s5727_s11 + $0x58] sm:$0xff] }
 0x452   :  { %v849_v26 = vpop.f32.mrb[8].mxu0 }
 0x453   :  { %v850_v27 = vadd.f32 %v3383_v23, %v849_v26  ;;  %v3916_v28 = vpop.f32.mrb[9].mxu0  ;;  %v4346_v23 = vpack.c.bf16 %v3420_v22, %v3419_v21 }
 0x455   :  { %v853_v30 = vmax.f32 %v850_v27, 0.0 }
 0x457   :  { %3926 = vmatmul.mubr.msk.f32.vlgmr.msra.gmra.mrb[10].mxu0 %vm61_vm1, %v853_v30  ;;  %v3415_v30 = vld [vmem:[%s5726_s10 + $0x2] ss:$0 sm:$0xff] }
 0x458   :  { %4326 = vmatpush3.bf16.msra.mxu0 %v4325_v29  ;;  %3955 = vmatprep.mubr.msk.f32.mxu0 %vm4631_vm0, %v4632_v6 }
 0x459   :  { %4327 = vmatprep.subr.bf16.mxu0 %v4630_v3 }
 0x45c   :  { %4329 = vmatpush3.bf16.msra.mxu0 %v4328_v33 }
 0x45d   :  { %4330 = vmatprep.subr.bf16.mxu0 %v4630_v3 }
 0x460   :  { %4332 = vmatpush3.bf16.msra.mxu0 %v4331_v36  ;;  %v4355_v36 = vpack.c.bf16 %v3432_v32, %v3431_v31  ;;  %v3451_v31 = vld [vmem:[%s5727_s11 + $0x70] sm:$0xff]  ;;  %v3452_v32 = vld [vmem:[%s5727_s11 + $0x78] sm:$0xff] }
 0x461   :  { %4333 = vmatprep.subr.bf16.mxu0 %v4630_v3 }
 0x464   :  { %4335 = vmatpush3.bf16.msra.mxu0 %v4334_v41  ;;  %v3435_v41 = vld [vmem:[%s5723_s7 + $0xe0] sm:$0xff] }
 0x465   :  { %4348 = vmatprep.subr.bf16.mxu0 %v4630_v3 }
 0x467   :  { %3956 = vmatmul.mubr.msk.f32.vlgmr.msra.gmra.mrb[12].mxu0 %vm151_vm2, %v1037_v42  ;;  %v3436_v42 = vld [vmem:[%s5723_s7 + $0xe8] sm:$0xff] }
 0x468   :  { %3988 = vmatprep.mubr.msk.f32.mxu0 %vm4631_vm0, %v4632_v6  ;;  %4350 = vmatpush3.bf16.msra.mxu0 %v4349_v61  ;;  %v4361_v43 = vpack.c.bf16 %v3436_v42, %v3435_v41  ;;  %v3447_v41 = vld [vmem:[%s5726_s10 + $0x3] ss:$0 sm:$0xff] }
 0x469   :  { %4351 = vmatprep.subr.bf16.mxu0 %v4630_v3  ;;  %v3463_v42 = vld [vmem:[%s5723_s7 + $0x100] sm:$0xff] }
 0x46c   :  { %4353 = vmatpush3.bf16.msra.mxu0 %v4352_v2  ;;  %v4367_v2 = vpack.c.bf16 %v3443_v0, %v3442_v62  ;;  %v3469_v62 = vld [vmem:[%s5723_s7 + $0x130] sm:$0xff]  ;;  %v3470_v0 = vld [vmem:[%s5723_s7 + $0x138] sm:$0xff] }
 0x46d   :  { %4366 = vmatprep.subr.bf16.mxu0 %v4630_v3 }
 0x46f   :  { %3989 = vmatmul.mubr.msk.f32.vlgmr.msra.gmra.mrb[14].mxu0 %vm61_vm1, %v4764_v16 }
 0x470   :  { %4018 = vmatprep.mubr.msk.f32.mxu0 %vm4631_vm0, %v4632_v6  ;;  %4368 = vmatpush3.bf16.msra.mxu0 %v4367_v2 }
 0x471   :  { %4369 = vmatprep.subr.bf16.mxu0 %v4630_v3 }
 0x4a6   :  { %v3135_v45 = vpop.xlane.xlu0 %3134 }
 0x4a7   :  { %v3136_v47 = vcvt.f32.s32 %v3135_v45  ;;  %v3429_v45 = vld [vmem:[%s5722_s6 + $0x3] ss:$0 sm:$0xff] }
 0x4a9   :  { %v3139_v48 = vadd.s32 %v3138_v46, %v3136_v47  ;;  %v3437_v46 = vld [vmem:[%s5723_s7 + $0xf0] sm:$0xff]  ;;  %v3438_v47 = vld [vmem:[%s5723_s7 + $0xf8] sm:$0xff] }
 0x4ab   :  { %vm3140_vm6 = vcmp.eq.s32.totalorder %v4986_v1, %v3139_v48 }
 0x4ac   :  { %v5049_v49 = vsel %vm3140_vm6, 1.0, %v4632_v6  ;;  %vm1668_vm6 = vcmp.eq.s32.totalorder %v4986_v1, 3 }
 0x4ad   :  { %vm3150_vm7 = vcmp.gt.f32.partialorder %v5049_v49, 0.0 }
 0x4ae   :  { %v5053_v50 = vsel %vm3150_vm7, -1.0, %v4939_v44  ;;  %vm2029_vm7 = vcmp.eq.s32.totalorder %v4986_v1, 4 }
 0x4af   :  { %v3152_v51 = vsel %vm225_vm3, %v5053_v50, -inf }
 0x4b0   :  { %3153 = vmax.xlane.f32.xlu1 %v3152_v51  ;;  %v4364_v51 = vpack.c.bf16 %v3438_v47, %v3437_v46 }
 0x52a   :  { %v5089_v4 = vpop.f32.mrb[10].mxu0 }
 0x52b   :  { %v3927_v7 = vpop.f32.mrb[11].mxu0 }
 0x52c   :  { %v3445_v7 = vld [vmem:[%s5725_s9 + $0x78] sm:$0xff] }
 0x53a   :  { %v1124_v9 = vpop.f32.mrb[12].mxu0 }
 0x53b   :  { %v5094_v10 = vadd.f32 %v3408_v8, %v1124_v9  ;;  %v3957_v11 = vpop.f32.mrb[13].mxu0  ;;  %v3456_v9 = vld [vmem:[%s5721_s5 + $0x80] sm:$0xff] }
 0x53c   :  { %v3457_v11 = vld [vmem:[%s5721_s5 + $0x88] sm:$0xff] }
 0x53d   :  { %3967 = vmatmul.mubr.msk.f32.vlgmr.msra.gmra.mrb[10].mxu1 %vm61_vm1, %v5094_v10  ;;  %v3154_v12 = vpop.xlane.xlu1 %3153 }
 0x53e   :  { %vm3155_vm8 = vcmp.eq.f32.partialorder %v5053_v50, %v3154_v12  ;;  %3977 = vmatprep.mubr.msk.f32.mxu1 %vm4631_vm0, %v4632_v6  ;;  %4344 = vmatpush3.bf16.msra.mxu1 %v4343_v20  ;;  %v4379_v12 = vpack.c.bf16 %v3457_v11, %v3456_v9  ;;  %v3422_v11 = vld [vmem:[%s5728_s12 + $0x2] ss:$0 sm:$0xff] }
 0x53f   :  { %v3156_v13 = vsel %vm3155_vm8, %v4986_v1, 8  ;;  %4345 = vmatprep.subr.bf16.mxu1 %v4630_v3  ;;  %vm2390_vm8 = vcmp.eq.s32.totalorder %v4986_v1, 5 }
 0x540   :  { %v3157_v14 = vsel %vm225_vm3, %v3156_v13, 2147483647  ;;  %v3458_v13 = vld [vmem:[%s5721_s5 + $0x90] sm:$0xff] }
 0x541   :  { %v3159_v15 = vshra.s32 %v3157_v14, 16  ;;  %v3158_v26 = vand.u32 65535, %v3157_v14  ;;  %v3459_v14 = vld [vmem:[%s5721_s5 + $0x98] sm:$0xff] }
 0x542   :  { %4347 = vmatpush3.bf16.msra.mxu1 %v4346_v23  ;;  %v1394_v24 = vpop.f32.mrb[14].mxu0 }
 0x543   :  { %v3161_v17 = vcvt.s32.f32 %v3159_v15  ;;  %4354 = vmatprep.subr.bf16.mxu1 %v4630_v3  ;;  %v3990_v25 = vpop.f32.mrb[15].mxu0  ;;  %v3160_v28 = vcvt.s32.f32 %v3158_v26  ;;  %v1395_v48 = vadd.f32 %v3429_v45, %v1394_v24  ;;  %v4382_v15 = vpack.c.bf16 %v3459_v14, %v3458_v13 }
 0x545   :  { %3162 = vmin.xlane.f32.xlu0 %v3161_v17  ;;  %v1398_v52 = vmax.f32 %v1395_v48, 0.0 }
 0x5d2   :  { %v3163_v27 = vpop.xlane.xlu0 %3162 }
 0x5d3   :  { %vm3164_vm9 = vcmp.eq.f32.partialorder %v3161_v17, %v3163_v27  ;;  %v3169_v53 = vcvt.f32.s32 %v3163_v27 }
 0x5d4   :  { %v3165_v29 = vsel %vm3164_vm9, %v3160_v28, inf  ;;  %v3449_v28 = vld [vmem:[%s5727_s11 + $0x60] sm:$0xff]  ;;  %vm2751_vm9 = vcmp.eq.s32.totalorder %v4986_v1, 6 }
 0x5d5   :  { %3166 = vmin.xlane.f32.xlu1 %v3165_v29  ;;  %v3170_v55 = vshll.u32 %v3169_v53, 16  ;;  %v3450_v29 = vld [vmem:[%s5727_s11 + $0x68] sm:$0xff]  ;;  %v3466_v53 = vld [vmem:[%s5723_s7 + $0x118] sm:$0xff] }
 0x610   :  { %v1210_v33 = vpop.f32.mrb[10].mxu1 }
 0x611   :  { %v1211_v34 = vadd.f32 %v3415_v30, %v1210_v33  ;;  %v3968_v35 = vpop.f32.mrb[11].mxu1  ;;  %v4373_v30 = vpack.c.bf16 %v3450_v29, %v3449_v28  ;;  %v4376_v33 = vpack.c.bf16 %v3452_v32, %v3451_v31  ;;  %v3475_v31 = vld [vmem:[%s5725_s9 + $0x88] sm:$0xff] }
 0x613   :  { %v1214_v37 = vmax.f32 %v1211_v34, 0.0 }
 0x615   :  { %3978 = vmatmul.mubr.msk.f32.vlgmr.msra.gmra.mrb[12].mxu1 %vm61_vm1, %v1214_v37 }
 0x616   :  { %4356 = vmatpush3.bf16.msra.mxu1 %v4355_v36  ;;  %4007 = vmatprep.mubr.msk.f32.mxu1 %vm4631_vm0, %v4632_v6 }
 0x617   :  { %4357 = vmatprep.subr.bf16.mxu1 %v4630_v3 }
 0x61a   :  { %4359 = vmatpush3.bf16.msra.mxu1 %v4358_v40  ;;  %v4633_v40 = vmov 0  }
 0x61b   :  { %4360 = vmatprep.subr.bf16.mxu1 %v4630_v3  ;;  %4512 = vset.pattern.permute.xlu1 %v4633_v40 }
 0x61c   :  { %4513 = vset.pattern.permute.xlu0 %v4633_v40  ;;  %v3490_v40 = vld [vmem:[%s5721_s5 + $0xb0] sm:$0xff] }
 0x61e   :  { %4362 = vmatpush3.bf16.msra.mxu1 %v4361_v43  ;;  %v3464_v43 = vld [vmem:[%s5723_s7 + $0x108] sm:$0xff] }
 0x61f   :  { %4363 = vmatprep.subr.bf16.mxu1 %v4630_v3  ;;  %v4385_v48 = vpack.c.bf16 %v3464_v43, %v3463_v42 }
 0x622   :  { %4365 = vmatpush3.bf16.msra.mxu1 %v4364_v51 }
 0x623   :  { %4378 = vmatprep.subr.bf16.mxu1 %v4630_v3 }
 0x625   :  { %4008 = vmatmul.mubr.msk.f32.vlgmr.msra.gmra.mrb[14].mxu1 %vm151_vm2, %v1398_v52  ;;  %v3465_v52 = vld [vmem:[%s5723_s7 + $0x110] sm:$0xff] }
 0x626   :  { %4040 = vmatprep.mubr.msk.f32.mxu1 %vm4631_vm0, %v4632_v6  ;;  %4380 = vmatpush3.bf16.msra.mxu1 %v4379_v12 }
 0x627   :  { %4381 = vmatprep.subr.bf16.mxu1 %v4630_v3 }
 0x62a   :  { %4383 = vmatpush3.bf16.msra.mxu1 %v4382_v15 }
 0x62b   :  { %4396 = vmatprep.subr.bf16.mxu1 %v4630_v3 }
 0x62d   :  { %4041 = vmatmul.mubr.msk.f32.vlgmr.msra.gmra.mrb[16].mxu1 %vm61_vm1, %v4764_v16 }
 0x62e   :  { %4070 = vmatprep.mubr.msk.f32.mxu1 %vm4631_vm0, %v4632_v6 }
 0x662   :  { %v3167_v54 = vpop.xlane.xlu1 %3166 }
 0x663   :  { %v3168_v56 = vcvt.f32.s32 %v3167_v54  ;;  %v4388_v54 = vpack.c.bf16 %v3466_v53, %v3465_v52 }
 0x665   :  { %v3171_v57 = vadd.s32 %v3170_v55, %v3168_v56  ;;  %v3467_v55 = vld [vmem:[%s5723_s7 + $0x120] sm:$0xff]  ;;  %v3468_v56 = vld [vmem:[%s5723_s7 + $0x128] sm:$0xff] }
 0x667   :  { %vm3172_vm10 = vcmp.eq.s32.totalorder %v4986_v1, %v3171_v57  ;;  %v4391_v57 = vpack.c.bf16 %v3468_v56, %v3467_v55 }
 0x668   :  { %v5159_v59 = vsel %vm3172_vm10, 1.0, %v4632_v6 }
 0x669   :  { %vm3182_vm11 = vcmp.gt.f32.partialorder %v5159_v59, 0.0 }
 0x66a   :  { %v5163_v60 = vsel %vm3182_vm11, -1.0, %v5053_v50  ;;  %v3444_v50 = vld [vmem:[%s5725_s9 + $0x70] sm:$0xff]  ;;  %vm3112_vm11 = vcmp.eq.s32.totalorder %v4986_v1, 7 }
 0x66b   :  { %v3184_v61 = vsel %vm225_vm3, %v5163_v60, -inf  ;;  %v4370_v8 = vpack.c.bf16 %v3445_v7, %v3444_v50  ;;  %v4394_v50 = vpack.c.bf16 %v3470_v0, %v3469_v62 }
 0x66c   :  { %3185 = vmax.xlane.f32.xlu0 %v3184_v61  ;;  %v3461_v61 = vld [vmem:[%s5722_s6 + $0x4] ss:$0 sm:$0xff] }
 0x66d   :  { %4371 = vmatpush3.bf16.msra.mxu0 %v4370_v8  ;;  %v3358_v8 = vld [vmem:[%s5728_s12] ss:$0 sm:$0xff] }
 0x66e   :  { %4372 = vmatprep.subr.bf16.mxu0 %v4630_v3  ;;  %v576_v9 = vadd.f32 %v3358_v8, %v4977_v58 }
 0x670   :  { %v579_v12 = vsub.f32 0.0, %v576_v9 }
 0x672   :  { %v580_v14 = vmul.f32 1.442695, %v579_v12 }
 0x674   :  { %4525 = vpow2.f32 %v580_v14  ;;  %v3481_v14 = vld [vmem:[%s5727_s11 + $0x80] sm:$0xff] }
 0x6e8   :  { %v5199_v17 = vpop.f32.mrb[12].mxu1 }
 0x6e9   :  { %v3979_v18 = vpop.f32.mrb[13].mxu1  ;;  %v1298_v13 = vadd.f32 %v3422_v11, %v5199_v17  ;;  %v4526_v17 = vpop.eup %4525 }
 0x6eb   :  { %v1301_v15 = vsub.f32 0.0, %v1298_v13 }
 0x6f8   :  { %v1485_v20 = vpop.f32.mrb[14].mxu1 }
 0x6f9   :  { %v5204_v21 = vadd.f32 %v3440_v19, %v1485_v20  ;;  %v4009_v22 = vpop.f32.mrb[15].mxu1  ;;  %v3186_v23 = vpop.xlane.xlu0 %3185  ;;  %v1302_v19 = vmul.f32 1.442695, %v1301_v15  ;;  %v3482_v15 = vld [vmem:[%s5727_s11 + $0x88] sm:$0xff] }
 0x6fa   :  { %vm3187_vm12 = vcmp.eq.f32.partialorder %v5163_v60, %v3186_v23 }
 0x6fb   :  { %4019 = vmatmul.mubr.msk.f32.vlgmr.msra.gmra.mrb[16].mxu0 %vm61_vm1, %v5204_v21  ;;  %v3188_v24 = vsel %vm3187_vm12, %v4986_v1, 8  ;;  %4527 = vpow2.f32 %v1302_v19  ;;  %v3483_v19 = vld [vmem:[%s5727_s11 + $0x90] sm:$0xff] }
 0x6fc   :  { %v3189_v25 = vsel %vm225_vm3, %v3188_v24, 2147483647  ;;  %4029 = vmatprep.mubr.msk.f32.mxu0 %vm4631_vm0, %v4632_v6  ;;  %4374 = vmatpush3.bf16.msra.mxu0 %v4373_v30  ;;  %v3474_v30 = vld [vmem:[%s5725_s9 + $0x80] sm:$0xff] }
 0x6fd   :  { %v3191_v26 = vshra.s32 %v3189_v25, 16  ;;  %4375 = vmatprep.subr.bf16.mxu0 %v4630_v3  ;;  %v3190_v36 = vand.u32 65535, %v3189_v25  ;;  %v4397_v32 = vpack.c.bf16 %v3475_v31, %v3474_v30  ;;  %v3496_v30 = vld [vmem:[%s5723_s7 + $0x148] sm:$0xff] }
 0x6ff   :  { %v3193_v27 = vcvt.s32.f32 %v3191_v26  ;;  %v3192_v38 = vcvt.s32.f32 %v3190_v36  ;;  %4398 = vmatpush3.bf16.msra.mxu1 %v4397_v32  ;;  %v3488_v36 = vld [vmem:[%s5721_s5 + $0xa0] sm:$0xff] }
 0x700   :  { %4377 = vmatpush3.bf16.msra.mxu0 %v4376_v33  ;;  %v1755_v34 = vpop.f32.mrb[16].mxu1  ;;  %4399 = vmatprep.subr.bf16.mxu1 %v4630_v3  ;;  %v3477_v33 = vld [vmem:[%s5725_s9 + $0x98] sm:$0xff] }
 0x701   :  { %3194 = vmin.xlane.f32.xlu1 %v3193_v27  ;;  %4384 = vmatprep.subr.bf16.mxu0 %v4630_v3  ;;  %v4042_v35 = vpop.f32.mrb[17].mxu1  ;;  %v1756_v2 = vadd.f32 %v3461_v61, %v1755_v34 }
 0x703   :  { %v1759_v7 = vmax.f32 %v1756_v2, 0.0 }
 0x705   :  { %v4528_v28 = vpop.eup %4527 }
 0x706   :  { %v1304_v29 = vadd.f32 1.0, %v4528_v28  ;;  %v3479_v28 = vld [vmem:[%s5726_s10 + $0x4] ss:$0 sm:$0xff] }
 0x78e   :  { %v3195_v37 = vpop.xlane.xlu1 %3194 }
 0x78f   :  { %vm3196_vm13 = vcmp.eq.f32.partialorder %v3193_v27, %v3195_v37  ;;  %v3201_v18 = vcvt.f32.s32 %v3195_v37  ;;  %v582_v27 = vadd.f32 1.0, %v4526_v17  ;;  %v3489_v37 = vld [vmem:[%s5721_s5 + $0xa8] sm:$0xff] }
 0x790   :  { %v3197_v39 = vsel %vm3196_vm13, %v3192_v38, inf  ;;  %v4409_v38 = vpack.c.bf16 %v3489_v37, %v3488_v36  ;;  %v3498_v36 = vld [vmem:[%s5723_s7 + $0x158] sm:$0xff] }
 0x791   :  { %3198 = vmin.xlane.f32.xlu0 %v3197_v39  ;;  %v3202_v22 = vshll.u32 %v3201_v18, 16  ;;  %4529 = vrcp.f32 %v582_v27  ;;  %v4403_v18 = vpack.c.bf16 %v3482_v15, %v3481_v14 }
 0x792   :  { %4531 = vrcp.f32 %v1304_v29  ;;  %v3495_v29 = vld [vmem:[%s5723_s7 + $0x140] sm:$0xff] }
 0x79b   :  { %v4530_v35 = vpop.eup %4529 }
 0x79c   :  { %v4532_v39 = vpop.eup %4531 }
 0x7ce   :  { %v1571_v45 = vpop.f32.mrb[16].mxu0 }
 0x7cf   :  { %v1572_v46 = vadd.f32 %v3447_v41, %v1571_v45  ;;  %v4020_v47 = vpop.f32.mrb[17].mxu0  ;;  %v3491_v41 = vld [vmem:[%s5721_s5 + $0xb8] sm:$0xff] }
 0x7d0   :  { %v4412_v42 = vpack.c.bf16 %v3491_v41, %v3490_v40  ;;  %v3493_v41 = vld [vmem:[%s5722_s6 + $0x5] ss:$0 sm:$0xff] }
 0x7d1   :  { %v1575_v51 = vmax.f32 %v1572_v46, 0.0  ;;  %v3390_v46 = vld [vmem:[%s5728_s12 + $0x1] ss:$0 sm:$0xff] }
 0x7d2   :  { %v937_v47 = vadd.f32 %v3390_v46, %v5089_v4 }
 0x7d3   :  { %4030 = vmatmul.mubr.msk.f32.vlgmr.msra.gmra.mrb[18].mxu0 %vm61_vm1, %v1575_v51 }
 0x7d4   :  { %4386 = vmatpush3.bf16.msra.mxu0 %v4385_v48  ;;  %4059 = vmatprep.mubr.msk.f32.mxu0 %vm4631_vm0, %v4632_v6  ;;  %v3454_v48 = vld [vmem:[%s5728_s12 + $0x3] ss:$0 sm:$0xff]  ;;  %v940_v51 = vsub.f32 0.0, %v937_v47 }
 0x7d5   :  { %4387 = vmatprep.subr.bf16.mxu0 %v4630_v3 }
 0x7d6   :  { %v941_v53 = vmul.f32 1.442695, %v940_v51  ;;  %v3507_v51 = vld [vmem:[%s5725_s9 + $0xa8] sm:$0xff] }
 0x7d8   :  { %4389 = vmatpush3.bf16.msra.mxu0 %v4388_v54  ;;  %4533 = vpow2.f32 %v941_v53  ;;  %v3508_v53 = vld [vmem:[%s5725_s9 + $0xb0] sm:$0xff] }
 0x7d9   :  { %4390 = vmatprep.subr.bf16.mxu0 %v4630_v3 }
 0x7dc   :  { %4392 = vmatpush3.bf16.msra.mxu0 %v4391_v57 }
 0x7dd   :  { %4393 = vmatprep.subr.bf16.mxu0 %v4630_v3 }
 0x7e0   :  { %4395 = vmatpush3.bf16.msra.mxu0 %v4394_v50 }
 0x7e1   :  { %4408 = vmatprep.subr.bf16.mxu0 %v4630_v3 }
 0x7e3   :  { %4060 = vmatmul.mubr.msk.f32.vlgmr.msra.gmra.mrb[20].mxu0 %vm151_vm2, %v1759_v7  ;;  %v4534_v7 = vpop.eup %4533 }
 0x7e4   :  { %4092 = vmatprep.mubr.msk.f32.mxu0 %vm4631_vm0, %v4632_v6  ;;  %4410 = vmatpush3.bf16.msra.mxu0 %v4409_v38  ;;  %v943_v8 = vadd.f32 1.0, %v4534_v7  ;;  %v3499_v38 = vld [vmem:[%s5723_s7 + $0x160] sm:$0xff] }
 0x7e5   :  { %4411 = vmatprep.subr.bf16.mxu0 %v4630_v3 }
 0x7e8   :  { %4413 = vmatpush3.bf16.msra.mxu0 %v4412_v42  ;;  %v3501_v42 = vld [vmem:[%s5723_s7 + $0x170] sm:$0xff] }
 0x7e9   :  { %4426 = vmatprep.subr.bf16.mxu0 %v4630_v3 }
 0x7eb   :  { %4093 = vmatmul.mubr.msk.f32.vlgmr.msra.gmra.mrb[22].mxu0 %vm61_vm1, %v4764_v16  ;;  %v3472_v16 = vld [vmem:[%s5724_s8 + $0x4] ss:$0 sm:$0xff] }
 0x7ec   :  { %4122 = vmatprep.mubr.msk.f32.mxu0 %vm4631_vm0, %v4632_v6 }
 0x81e   :  { %v3199_v20 = vpop.xlane.xlu0 %3198 }
 0x81f   :  { %v3200_v23 = vcvt.f32.s32 %v3199_v20  ;;  %v3484_v20 = vld [vmem:[%s5727_s11 + $0x98] sm:$0xff] }
 0x821   :  { %v3203_v24 = vadd.s32 %v3202_v22, %v3200_v23  ;;  %v4406_v22 = vpack.c.bf16 %v3484_v20, %v3483_v19 }
 0x823   :  { %vm3204_vm14 = vcmp.eq.s32.totalorder %v4986_v1, %v3203_v24 }
 0x824   :  { %v5277_v58 = vsel %vm3204_vm14, 1.0, %v4632_v6 }
 0x825   :  { %vm3214_vm15 = vcmp.gt.f32.partialorder %v5277_v58, 0.0 }
 0x826   :  { %v3215_v25 = vsel %vm3214_vm15, -1.0, %v5163_v60  ;;  %v3476_v60 = vld [vmem:[%s5725_s9 + $0x90] sm:$0xff] }
 0x827   :  { %v3216_v26 = vsel %vm225_vm3, %v3215_v25, -inf  ;;  %v4400_v34 = vpack.c.bf16 %v3477_v33, %v3476_v60  ;;  %v4415_v33 = vpack.c.bf16 %v3496_v30, %v3495_v29 }
 0x828   :  { %3217 = vmax.xlane.f32.xlu1 %v3216_v26 }
 0x829   :  { %4401 = vmatpush3.bf16.msra.mxu1 %v4400_v34 }
 0x82a   :  { %4402 = vmatprep.subr.bf16.mxu1 %v4630_v3 }
 0x839   :  { %588 = vperm.xlu1 %4512, %v4530_v35   ;;  %v3497_v35 = vld [vmem:[%s5723_s7 + $0x150] sm:$0xff] }
 0x83a   :  { %v4418_v37 = vpack.c.bf16 %v3498_v36, %v3497_v35 }
 0x83d   :  { %1310 = vperm.xlu1 %4512, %v4532_v39   ;;  %v3500_v39 = vld [vmem:[%s5723_s7 + $0x168] sm:$0xff] }
 0x83e   :  { %v4421_v40 = vpack.c.bf16 %v3500_v39, %v3499_v38  ;;  %v3529_v38 = vld [vmem:[%s5723_s7 + $0x190] sm:$0xff]  ;;  %v3530_v39 = vld [vmem:[%s5723_s7 + $0x198] sm:$0xff] }
 0x8a6   :  { %v1658_v43 = vpop.f32.mrb[18].mxu0 }
 0x8a7   :  { %v4031_v45 = vpop.f32.mrb[19].mxu0  ;;  %v1659_v52 = vadd.f32 %v3454_v48, %v1658_v43  ;;  %v3502_v43 = vld [vmem:[%s5723_s7 + $0x178] sm:$0xff]  ;;  %v3506_v48 = vld [vmem:[%s5725_s9 + $0xa0] sm:$0xff] }
 0x8a8   :  { %v4424_v46 = vpack.c.bf16 %v3502_v43, %v3501_v42  ;;  %v3532_v42 = vld [vmem:[%s5723_s7 + $0x1a8] sm:$0xff] }
 0x8a9   :  { %v1662_v54 = vsub.f32 0.0, %v1659_v52  ;;  %v4427_v52 = vpack.c.bf16 %v3507_v51, %v3506_v48 }
 0x8ab   :  { %v1663_v57 = vmul.f32 1.442695, %v1662_v54  ;;  %4428 = vmatpush3.bf16.msra.mxu0 %v4427_v52  ;;  %v3509_v54 = vld [vmem:[%s5725_s9 + $0xb8] sm:$0xff] }
 0x8ac   :  { %4429 = vmatprep.subr.bf16.mxu0 %v4630_v3 }
 0x8ad   :  { %4535 = vpow2.f32 %v1663_v57  ;;  %v3522_v57 = vld [vmem:[%s5721_s5 + $0xd0] sm:$0xff] }
 0x8ae   :  { %4537 = vrcp.f32 %v943_v8 }
 0x8b5   :  { %v3218_v55 = vpop.xlane.xlu1 %3217 }
 0x8b6   :  { %v1846_v56 = vpop.f32.mrb[20].mxu0  ;;  %vm3219_vm4 = vcmp.eq.f32.partialorder %v3215_v25, %v3218_v55  ;;  %v3520_v55 = vld [vmem:[%s5721_s5 + $0xc0] sm:$0xff] }
 0x8b7   :  { %v5324_v61 = vadd.f32 %v3472_v16, %v1846_v56  ;;  %v4061_v4 = vpop.f32.mrb[21].mxu0  ;;  %v3220_v62 = vsel %vm3219_vm4, %v4986_v1, 8  ;;  %v4536_v9 = vpop.eup %4535  ;;  %v4430_v16 = vpack.c.bf16 %v3509_v54, %v3508_v53  ;;  %v3521_v56 = vld [vmem:[%s5721_s5 + $0xc8] sm:$0xff]  ;;  %v3538_v53 = vld [vmem:[%s5725_s9 + $0xc0] sm:$0xff] }
 0x8b8   :  { %v3221_v0 = vsel %vm225_vm3, %v3220_v62, 2147483647  ;;  %v1665_v11 = vadd.f32 1.0, %v4536_v9  ;;  %v4538_v12 = vpop.eup %4537  ;;  %v4439_v4 = vpack.c.bf16 %v3521_v56, %v3520_v55  ;;  %v3523_v62 = vld [vmem:[%s5721_s5 + $0xd8] sm:$0xff]  ;;  %v3539_v54 = vld [vmem:[%s5725_s9 + $0xc8] sm:$0xff]  ;;  %v3540_v55 = vld [vmem:[%s5725_s9 + $0xd0] sm:$0xff] }
 0x8b9   :  { %4071 = vmatmul.mubr.msk.f32.vlgmr.msra.gmra.mrb[18].mxu1 %vm61_vm1, %v5324_v61  ;;  %v3223_v2 = vshra.s32 %v3221_v0, 16  ;;  %v3222_v25 = vand.u32 65535, %v3221_v0  ;;  %4431 = vmatpush3.bf16.msra.mxu0 %v4430_v16  ;;  %v4442_v0 = vpack.c.bf16 %v3523_v62, %v3522_v57  ;;  %v4457_v16 = vpack.c.bf16 %v3539_v54, %v3538_v53  ;;  %v3541_v56 = vld [vmem:[%s5725_s9 + $0xd8] sm:$0xff]  ;;  %v3553_v62 = vld [vmem:[%s5721_s5 + $0xe8] sm:$0xff] }
 0x8ba   :  { %4081 = vmatprep.mubr.msk.f32.mxu1 %vm4631_vm0, %v4632_v6  ;;  %4539 = vrcp.f32 %v1665_v11  ;;  %4404 = vmatpush3.bf16.msra.mxu1 %v4403_v18  ;;  %v4460_v57 = vpack.c.bf16 %v3541_v56, %v3540_v55  ;;  %v3570_v55 = vld [vmem:[%s5725_s9 + $0xe0] sm:$0xff]  ;;  %v3571_v56 = vld [vmem:[%s5725_s9 + $0xe8] sm:$0xff] }
 0x8bb   :  { %v3225_v50 = vcvt.s32.f32 %v3223_v2  ;;  %4405 = vmatprep.subr.bf16.mxu1 %v4630_v3  ;;  %v3224_v26 = vcvt.s32.f32 %v3222_v25  ;;  %4432 = vmatprep.subr.bf16.mxu0 %v4630_v3  ;;  %v5420_v2 = vld [vmem:[%s5716_s0] sm:$0xf] }
 0x8bd   :  { %3226 = vmin.xlane.f32.xlu0 %v3225_v50 }
 0x8be   :  { %4407 = vmatpush3.bf16.msra.mxu1 %v4406_v22  ;;  %v2116_v23 = vpop.f32.mrb[22].mxu0 }
 0x8bf   :  { %4414 = vmatprep.subr.bf16.mxu1 %v4630_v3  ;;  %v4094_v24 = vpop.f32.mrb[23].mxu0  ;;  %v2117_v45 = vadd.f32 %v3493_v41, %v2116_v23  ;;  %v3513_v23 = vld [vmem:[%s5727_s11 + $0xa0] sm:$0xff] }
 0x8c0   :  { %v3514_v24 = vld [vmem:[%s5727_s11 + $0xa8] sm:$0xff]  ;;  %v3531_v41 = vld [vmem:[%s5723_s7 + $0x1a0] sm:$0xff] }
 0x8c1   :  { %v2120_v47 = vmax.f32 %v2117_v45, 0.0  ;;  %v4433_v25 = vpack.c.bf16 %v3514_v24, %v3513_v23  ;;  %v4451_v43 = vpack.c.bf16 %v3532_v42, %v3531_v41  ;;  %v3525_v45 = vld [vmem:[%s5722_s6 + $0x6] ss:$0 sm:$0xff]  ;;  %v3561_v41 = vld [vmem:[%s5723_s7 + $0x1d0] sm:$0xff]  ;;  %v3562_v42 = vld [vmem:[%s5723_s7 + $0x1d8] sm:$0xff] }
 0x8c4   :  { %v4540_v13 = vpop.eup %4539 }
 0x8d3   :  { %949 = vperm.xlu0 %4513, %v4538_v12  }
 0x8d7   :  { %1671 = vperm.xlu0 %4513, %v4540_v13   ;;  %v3504_v13 = vld [vmem:[%s5724_s8 + $0x5] ss:$0 sm:$0xff] }
 0x94a   :  { %v5346_v17 = vpop.xlane.xlu0 %3226 }
 0x94b   :  { %vm3228_vm5 = vcmp.eq.f32.partialorder %v3225_v50, %v5346_v17  ;;  %v3486_v50 = vld [vmem:[%s5728_s12 + $0x4] ss:$0 sm:$0xff] }
 0x94c   :  { %v3229_v27 = vsel %vm3228_vm5, %v3224_v26, inf  ;;  %v3515_v26 = vld [vmem:[%s5727_s11 + $0xb0] sm:$0xff] }
 0x94d   :  { %3230 = vmin.xlane.f32.xlu1 %v3229_v27  ;;  %v3516_v27 = vld [vmem:[%s5727_s11 + $0xb8] sm:$0xff] }
 0x98c   :  { %v1932_v31 = vpop.f32.mrb[18].mxu1 }
 0x98d   :  { %v1933_v32 = vadd.f32 %v3479_v28, %v1932_v31  ;;  %v4072_v60 = vpop.f32.mrb[19].mxu1  ;;  %v4436_v28 = vpack.c.bf16 %v3516_v27, %v3515_v26  ;;  %v3511_v31 = vld [vmem:[%s5726_s10 + $0x5] ss:$0 sm:$0xff]  ;;  %v3546_v27 = vld [vmem:[%s5727_s11 + $0xc8] sm:$0xff] }
 0x98e   :  { %v3528_v60 = vld [vmem:[%s5723_s7 + $0x188] sm:$0xff]  ;;  %v3545_v26 = vld [vmem:[%s5727_s11 + $0xc0] sm:$0xff] }
 0x98f   :  { %v1936_v34 = vmax.f32 %v1933_v32, 0.0  ;;  %v3527_v32 = vld [vmem:[%s5723_s7 + $0x180] sm:$0xff] }
 0x990   :  { %v4445_v36 = vpack.c.bf16 %v3528_v60, %v3527_v32 }
 0x991   :  { %4082 = vmatmul.mubr.msk.f32.vlgmr.msra.gmra.mrb[20].mxu1 %vm61_vm1, %v1936_v34 }
 0x992   :  { %4416 = vmatpush3.bf16.msra.mxu1 %v4415_v33  ;;  %4111 = vmatprep.mubr.msk.f32.mxu1 %vm4631_vm0, %v4632_v6 }
 0x993   :  { %4417 = vmatprep.subr.bf16.mxu1 %v4630_v3 }
 0x996   :  { %4419 = vmatpush3.bf16.msra.mxu1 %v4418_v37 }
 0x997   :  { %4420 = vmatprep.subr.bf16.mxu1 %v4630_v3 }
 0x99a   :  { %4422 = vmatpush3.bf16.msra.mxu1 %v4421_v40  ;;  %v4448_v40 = vpack.c.bf16 %v3530_v39, %v3529_v38 }
 0x99b   :  { %4423 = vmatprep.subr.bf16.mxu1 %v4630_v3 }
 0x99e   :  { %4425 = vmatpush3.bf16.msra.mxu1 %v4424_v46  ;;  %v3533_v46 = vld [vmem:[%s5723_s7 + $0x1b0] sm:$0xff] }
 0x99f   :  { %4438 = vmatprep.subr.bf16.mxu1 %v4630_v3 }
 0x9a1   :  { %4112 = vmatmul.mubr.msk.f32.vlgmr.msra.gmra.mrb[22].mxu1 %vm151_vm2, %v2120_v47  ;;  %v3534_v47 = vld [vmem:[%s5723_s7 + $0x1b8] sm:$0xff] }
 0x9a2   :  { %4144 = vmatprep.mubr.msk.f32.mxu1 %vm4631_vm0, %v4632_v6  ;;  %4440 = vmatpush3.bf16.msra.mxu1 %v4439_v4  ;;  %v4454_v51 = vpack.c.bf16 %v3534_v47, %v3533_v46  ;;  %v3552_v4 = vld [vmem:[%s5721_s5 + $0xe0] sm:$0xff]  ;;  %v3564_v46 = vld [vmem:[%s5723_s7 + $0x1e8] sm:$0xff] }
 0x9a3   :  { %4441 = vmatprep.subr.bf16.mxu1 %v4630_v3 }
 0x9a6   :  { %4443 = vmatpush3.bf16.msra.mxu1 %v4442_v0  ;;  %v3554_v0 = vld [vmem:[%s5721_s5 + $0xf0] sm:$0xff] }
 0x9a7   :  { %4456 = vmatprep.subr.bf16.mxu1 %v4630_v3 }
 0x9a9   :  { %4145 = vmatmul.mubr.msk.f32.vlgmr.msra.gmra.mrb[24].mxu1 %vm61_vm1, %v5420_v2 }
 0x9aa   :  { %4174 = vmatprep.mubr.msk.f32.mxu1 %vm4631_vm0, %v4632_v6  ;;  %4458 = vmatpush3.bf16.msra.mxu1 %v4457_v16 }
 0x9ab   :  { %4459 = vmatprep.subr.bf16.mxu1 %v4630_v3 }
 0x9ae   :  { %4461 = vmatpush3.bf16.msra.mxu1 %v4460_v57  ;;  %v4487_v57 = vpack.c.bf16 %v3571_v56, %v3570_v55 }
 0x9af   :  { %4462 = vmatprep.subr.bf16.mxu1 %v4630_v3 }
 0xa64   :  { %v2019_v7 = vpop.f32.mrb[20].mxu1 }
 0xa65   :  { %v2020_v8 = vadd.f32 %v3486_v50, %v2019_v7  ;;  %v4083_v9 = vpop.f32.mrb[21].mxu1  ;;  %v4469_v50 = vpack.c.bf16 %v3553_v62, %v3552_v4  ;;  %v3555_v7 = vld [vmem:[%s5721_s5 + $0xf8] sm:$0xff]  ;;  %v3572_v4 = vld [vmem:[%s5725_s9 + $0xf0] sm:$0xff] }
 0xa66   :  { %v3518_v9 = vld [vmem:[%s5728_s12 + $0x5] ss:$0 sm:$0xff]  ;;  %v3573_v62 = vld [vmem:[%s5725_s9 + $0xf8] sm:$0xff] }
 0xa67   :  { %v2023_v11 = vsub.f32 0.0, %v2020_v8  ;;  %v4472_v8 = vpack.c.bf16 %v3555_v7, %v3554_v0  ;;  %v4490_v0 = vpack.c.bf16 %v3573_v62, %v3572_v4 }
 0xa69   :  { %v2024_v12 = vmul.f32 1.442695, %v2023_v11 }
 0xa6b   :  { %4541 = vpow2.f32 %v2024_v12 }
 0xa74   :  { %v2207_v14 = vpop.f32.mrb[22].mxu1 }
 0xa75   :  { %v4542_v15 = vpop.eup %4541  ;;  %v5432_v18 = vadd.f32 %v3504_v13, %v2207_v14  ;;  %v4113_v19 = vpop.f32.mrb[23].mxu1 }
 0xa76   :  { %v2026_v20 = vadd.f32 1.0, %v4542_v15  ;;  %v3536_v19 = vld [vmem:[%s5724_s8 + $0x6] ss:$0 sm:$0xff] }
 0xa77   :  { %4123 = vmatmul.mubr.msk.f32.vlgmr.msra.gmra.mrb[24].mxu0 %vm61_vm1, %v5432_v18 }
 0xa78   :  { %4543 = vrcp.f32 %v2026_v20  ;;  %4133 = vmatprep.mubr.msk.f32.mxu0 %vm4631_vm0, %v4632_v6  ;;  %4434 = vmatpush3.bf16.msra.mxu0 %v4433_v25 }
 0xa79   :  { %4435 = vmatprep.subr.bf16.mxu0 %v4630_v3 }
 0xa7c   :  { %4437 = vmatpush3.bf16.msra.mxu0 %v4436_v28  ;;  %v2477_v29 = vpop.f32.mrb[24].mxu1  ;;  %v4463_v28 = vpack.c.bf16 %v3546_v27, %v3545_v26  ;;  %v3579_v27 = vld [vmem:[%s5727_s11 + $0xf0] sm:$0xff] }
 0xa7d   :  { %4444 = vmatprep.subr.bf16.mxu0 %v4630_v3  ;;  %v4146_v30 = vpop.f32.mrb[25].mxu1  ;;  %v2478_v48 = vadd.f32 %v3525_v45, %v2477_v29  ;;  %v3547_v29 = vld [vmem:[%s5727_s11 + $0xd0] sm:$0xff]  ;;  %v3563_v45 = vld [vmem:[%s5723_s7 + $0x1e0] sm:$0xff] }
 0xa7e   :  { %v3548_v30 = vld [vmem:[%s5727_s11 + $0xd8] sm:$0xff]  ;;  %v4481_v47 = vpack.c.bf16 %v3564_v46, %v3563_v45 }
 0xa7f   :  { %v2481_v52 = vmax.f32 %v2478_v48, 0.0  ;;  %v3557_v48 = vld [vmem:[%s5722_s6 + $0x7] ss:$0 sm:$0xff] }
 0xa82   :  { %v4544_v22 = vpop.eup %4543 }
 0xa83   :  { %2032 = vperm.xlu0 %4513, %v4544_v22  }
 0xb4a   :  { %v2293_v33 = vpop.f32.mrb[24].mxu0 }
 0xb4b   :  { %v2294_v34 = vadd.f32 %v3511_v31, %v2293_v33  ;;  %v4124_v35 = vpop.f32.mrb[25].mxu0  ;;  %v4466_v31 = vpack.c.bf16 %v3548_v30, %v3547_v29  ;;  %v3543_v33 = vld [vmem:[%s5726_s10 + $0x6] ss:$0 sm:$0xff]  ;;  %v3575_v30 = vld [vmem:[%s5726_s10 + $0x7] ss:$0 sm:$0xff]  ;;  %s4641_s10 = smov [#allocation4]  }
 0xb4c   :  { %v3560_v35 = vld [vmem:[%s5723_s7 + $0x1c8] sm:$0xff] }
 0xb4d   :  { %v2297_v37 = vmax.f32 %v2294_v34, 0.0  ;;  %v3559_v34 = vld [vmem:[%s5723_s7 + $0x1c0] sm:$0xff] }
 0xb4e   :  { %v4475_v39 = vpack.c.bf16 %v3560_v35, %v3559_v34 }
 0xb4f   :  { %4134 = vmatmul.mubr.msk.f32.vlgmr.msra.gmra.mrb[26].mxu0 %vm61_vm1, %v2297_v37 }
 0xb50   :  { %4446 = vmatpush3.bf16.msra.mxu0 %v4445_v36  ;;  %4163 = vmatprep.mubr.msk.f32.mxu0 %vm4631_vm0, %v4632_v6 }
 0xb51   :  { %4447 = vmatprep.subr.bf16.mxu0 %v4630_v3 }
 0xb54   :  { %4449 = vmatpush3.bf16.msra.mxu0 %v4448_v40 }
 0xb55   :  { %4450 = vmatprep.subr.bf16.mxu0 %v4630_v3 }
 0xb58   :  { %4452 = vmatpush3.bf16.msra.mxu0 %v4451_v43  ;;  %v4478_v43 = vpack.c.bf16 %v3562_v42, %v3561_v41  ;;  %v589_v42 = vpop.permute.xlu1 %588 }
 0xb59   :  { %4453 = vmatprep.subr.bf16.mxu0 %v4630_v3 }
 0xb5c   :  { %4455 = vmatpush3.bf16.msra.mxu0 %v4454_v51  ;;  %v3565_v51 = vld [vmem:[%s5723_s7 + $0x1f0] sm:$0xff]  ;;  %v1311_v45 = vpop.permute.xlu1 %1310 }
 0xb5d   :  { %4468 = vmatprep.subr.bf16.mxu0 %v4630_v3 }
 0xb5f   :  { %4164 = vmatmul.mubr.msk.f32.vlgmr.msra.gmra.mrb[28].mxu0 %vm151_vm2, %v2481_v52  ;;  %v3566_v52 = vld [vmem:[%s5723_s7 + $0x1f8] sm:$0xff] }
 0xb60   :  { %4196 = vmatprep.mubr.msk.f32.mxu0 %vm4631_vm0, %v4632_v6  ;;  %4470 = vmatpush3.bf16.msra.mxu0 %v4469_v50  ;;  %v4484_v54 = vpack.c.bf16 %v3566_v52, %v3565_v51  ;;  %v3550_v50 = vld [vmem:[%s5728_s12 + $0x6] ss:$0 sm:$0xff]  ;;  %v3231_v52 = vpop.xlane.xlu1 %3230 }
 0xb61   :  { %4471 = vmatprep.subr.bf16.mxu0 %v4630_v3  ;;  %v3232_v56 = vcvt.f32.s32 %v3231_v52 }
 0xb64   :  { %4473 = vmatpush3.bf16.msra.mxu0 %v4472_v8 }
 0xb65   :  { %4486 = vmatprep.subr.bf16.mxu0 %v4630_v3 }
 0xb67   :  { %4197 = vmatmul.mubr.msk.f32.vlgmr.msra.gmra.mrb[30].mxu0 %vm61_vm1, %v5420_v2 }
 0xb68   :  { %4226 = vmatprep.mubr.msk.f32.mxu0 %vm4631_vm0, %v4632_v6  ;;  %4488 = vmatpush3.bf16.msra.mxu0 %v4487_v57 }
 0xb69   :  { %4489 = vmatprep.subr.bf16.mxu0 %v4630_v3 }
 0xb6c   :  { %4491 = vmatpush3.bf16.msra.mxu0 %v4490_v0 }
 0xb6d   :  { %4492 = vmatprep.subr.bf16.mxu0 %v4630_v3 }
 0xc22   :  { %v2380_v11 = vpop.f32.mrb[26].mxu0 }
 0xc23   :  { %v2381_v12 = vadd.f32 %v3518_v9, %v2380_v11  ;;  %v4135_v13 = vpop.f32.mrb[27].mxu0 }
 0xc24   :  { %v3568_v13 = vld [vmem:[%s5724_s8 + $0x7] ss:$0 sm:$0xff] }
 0xc25   :  { %v2384_v14 = vsub.f32 0.0, %v2381_v12 }
 0xc27   :  { %v2385_v15 = vmul.f32 1.442695, %v2384_v14 }
 0xc29   :  { %4545 = vpow2.f32 %v2385_v15 }
 0xc32   :  { %v2568_v20 = vpop.f32.mrb[28].mxu0 }
 0xc33   :  { %v4546_v22 = vpop.eup %4545  ;;  %v5530_v2 = vadd.f32 %v3536_v19, %v2568_v20  ;;  %v4165_v23 = vpop.f32.mrb[29].mxu0 }
 0xc34   :  { %v2387_v24 = vadd.f32 1.0, %v4546_v22 }
 0xc35   :  { %4175 = vmatmul.mubr.msk.f32.vlgmr.msra.gmra.mrb[26].mxu1 %vm61_vm1, %v5530_v2 }
 0xc36   :  { %4547 = vrcp.f32 %v2387_v24  ;;  %4185 = vmatprep.mubr.msk.f32.mxu1 %vm4631_vm0, %v4632_v6  ;;  %4464 = vmatpush3.bf16.msra.mxu1 %v4463_v28  ;;  %v3577_v24 = vld [vmem:[%s5727_s11 + $0xe0] sm:$0xff]  ;;  %v3580_v28 = vld [vmem:[%s5727_s11 + $0xf8] sm:$0xff] }
 0xc37   :  { %4465 = vmatprep.subr.bf16.mxu1 %v4630_v3  ;;  %v4496_v29 = vpack.c.bf16 %v3580_v28, %v3579_v27 }
 0xc3a   :  { %4467 = vmatpush3.bf16.msra.mxu1 %v4466_v31  ;;  %v2838_v32 = vpop.f32.mrb[30].mxu0 }
 0xc3b   :  { %4474 = vmatprep.subr.bf16.mxu1 %v4630_v3  ;;  %v4198_v60 = vpop.f32.mrb[31].mxu0  ;;  %v2839_v53 = vadd.f32 %v3557_v48, %v2838_v32 }
 0xc3d   :  { %v2842_v16 = vmax.f32 %v2839_v53, 0.0  ;;  %v3233_v53 = vcvt.f32.s32 %v5346_v17 }
 0xc3f   :  { %v3234_v4 = vshll.u32 %v3233_v53, 16 }
 0xc40   :  { %v4548_v25 = vpop.eup %4547 }
 0xc41   :  { %2393 = vperm.xlu0 %4513, %v4548_v25   ;;  %v3578_v25 = vld [vmem:[%s5727_s11 + $0xe8] sm:$0xff]  ;;  %v3235_v17 = vadd.s32 %v3234_v4, %v3232_v56  ;;  %s3323_s11 = sshll.u32 %s4641_s10, 4  ;;  %s3324_s11 = int_to_ptr.vmem [resolvable:$true] %s3323_s11 }
 0xc42   :  { %v4493_v26 = vpack.c.bf16 %v3578_v25, %v3577_v24  ;;  %p4565_p1 = scmp.lt.s32.totalorder %s3324_s11, %s3324_s11 }
 0xc43   :  { %vm3236_vm10 = vcmp.eq.s32.totalorder %v4986_v1, %v3235_v17 }
 0xd08   :  { %v2654_v36 = vpop.f32.mrb[26].mxu1 }
 0xd09   :  { %v2655_v37 = vadd.f32 %v3543_v33, %v2654_v36  ;;  %v4176_v38 = vpop.f32.mrb[27].mxu1 }
 0xd0b   :  { %v2658_v40 = vmax.f32 %v2655_v37, 0.0 }
 0xd0d   :  { %4186 = vmatmul.mubr.msk.f32.vlgmr.msra.gmra.mrb[28].mxu1 %vm61_vm1, %v2658_v40 }
 0xd0e   :  { %4476 = vmatpush3.bf16.msra.mxu1 %v4475_v39  ;;  %4215 = vmatprep.mubr.msk.f32.mxu1 %vm4631_vm0, %v4632_v6 }
 0xd0f   :  { %4477 = vmatprep.subr.bf16.mxu1 %v4630_v3 }
 0xd12   :  { %4479 = vmatpush3.bf16.msra.mxu1 %v4478_v43  ;;  %v950_v43 = vpop.permute.xlu0 %949 }
 0xd13   :  { %4480 = vmatprep.subr.bf16.mxu1 %v4630_v3 }
 0xd16   :  { %4482 = vmatpush3.bf16.msra.mxu1 %v4481_v47  ;;  %v1672_v47 = vpop.permute.xlu0 %1671 }
 0xd17   :  { %4483 = vmatprep.subr.bf16.mxu1 %v4630_v3  ;;  %v1674_v57 = vsel %vm1668_vm6, %v1672_v47, 0.0 }
 0xd1a   :  { %4485 = vmatpush3.bf16.msra.mxu1 %v4484_v54  ;;  %v2033_v54 = vpop.permute.xlu0 %2032 }
 0xd1b   :  { %v2035_v0 = vsel %vm2029_vm7, %v2033_v54, 0.0 }
 0xd1d   :  { %4216 = vmatmul.mubr.msk.f32.vlgmr.msra.gmra.mrb[30].mxu1 %vm151_vm2, %v2842_v16  ;;  %vm1307_vm2 = vcmp.eq.s32.totalorder %v4986_v1, 2 }
 0xd1e   :  { %v1313_v16 = vsel %vm1307_vm2, %v1311_v45, 0.0  ;;  %v2394_v62 = vpop.permute.xlu0 %2393 }
 0xde0   :  { %v2741_v7 = vpop.f32.mrb[28].mxu1 }
 0xde1   :  { %v2742_v8 = vadd.f32 %v3550_v50, %v2741_v7  ;;  %v4187_v9 = vpop.f32.mrb[29].mxu1 }
 0xde3   :  { %v2745_v11 = vsub.f32 0.0, %v2742_v8  ;;  %v2396_v8 = vsel %vm2390_vm8, %v2394_v62, 0.0 }
 0xde5   :  { %v2746_v12 = vmul.f32 1.442695, %v2745_v11 }
 0xde7   :  { %4549 = vpow2.f32 %v2746_v12 }
 0xdf0   :  { %v2929_v14 = vpop.f32.mrb[30].mxu1 }
 0xdf1   :  { %v4550_v15 = vpop.eup %4549  ;;  %v5607_v19 = vadd.f32 %v3568_v13, %v2929_v14  ;;  %v4217_v20 = vpop.f32.mrb[31].mxu1  ;;  %v3175_v13 = vadd.f32 %v5159_v59, %v5049_v49 }
 0xdf2   :  { %v2748_v22 = vadd.f32 1.0, %v4550_v15 }
 0xdf3   :  { %4227 = vmatmul.mubr.msk.f32.vlgmr.msra.gmra.mrb[32].mxu0 %vm61_vm1, %v5607_v19  ;;  %v3207_v24 = vadd.f32 %v5277_v58, %v3175_v13 }
 0xdf4   :  { %4551 = vrcp.f32 %v2748_v22  ;;  %4237 = vmatprep.mubr.msk.f32.mxu0 %vm4631_vm0, %v4632_v6  ;;  %4494 = vmatpush3.bf16.msra.mxu0 %v4493_v26  ;;  %vm946_vm0 = vcmp.eq.s32.totalorder %v4986_v1, 1  ;;  %v3587_v22 = vsel %vm3236_vm10, 1.0, %v4632_v6 }
 0xdf5   :  { %4495 = vmatprep.subr.bf16.mxu0 %v4630_v3  ;;  %v3582_v3 = vld [vmem:[%s5728_s12 + $0x7] ss:$0 sm:$0xff]  ;;  %v952_v46 = vsel %vm946_vm0, %v950_v43, 0.0  ;;  %v3239_v26 = vadd.f32 %v3587_v22, %v3207_v24  ;;  %s4560_s12 = scalar_lea.vmem %s3324_s11, 64 }
 0xdf6   :  { %p4561_p0 = scmp.ne.s32.totalorder %s3324_s11, %s4560_s12  ;;  %p4566_p2 = scmp.lt.s32.totalorder %s4560_s12, %s4560_s12 }
 0xdf8   :  { %4497 = vmatpush3.bf16.msra.mxu0 %v4496_v29  ;;  %p4567_p3 = por %p4566_p2, %p4565_p1 }
 0xdfa   :  { %p4568_p4 = pnand %p4567_p3, %p4561_p0 }
 0xdfe   :  { %v4552_v23 = vpop.eup %4551 }
 0xdff   :  { %2754 = vperm.xlu1 %4512, %v4552_v23  }
 0xe7e   :  { %v2755_v7 = vpop.permute.xlu1 %2754 }
 0xe7f   :  { %v2757_v11 = vsel %vm2751_vm9, %v2755_v7, 0.0 }
 0xec6   :  { %v3015_v31 = vpop.f32.mrb[32].mxu0 }
 0xec7   :  { %v3016_v32 = vadd.f32 %v3575_v30, %v3015_v31  ;;  %v4228_v60 = vpop.f32.mrb[33].mxu0 }
 0xec9   :  { %v3019_v33 = vmax.f32 %v3016_v32, 0.0 }
 0xecb   :  { %4238 = vmatmul.mubr.msk.f32.vlgmr.msra.gmra.mrb[34].mxu0 %vm61_vm1, %v3019_v33  ;;  %vm585_vm1 = vcmp.eq.s32.totalorder %v4986_v1, 0 }
 0xecc   :  { %v591_v48 = vsel %vm585_vm1, %v589_v42, 0.0 }
 0xecd   :  { %v953_v51 = vadd.f32 %v952_v46, %v591_v48 }
 0xecf   :  { %v1314_v55 = vadd.f32 %v1313_v16, %v953_v51 }
 0xed1   :  { %v1675_v50 = vadd.f32 %v1674_v57, %v1314_v55 }
 0xed3   :  { %v2036_v9 = vadd.f32 %v2035_v0, %v1675_v50 }
 0xed5   :  { %v2397_v12 = vadd.f32 %v2396_v8, %v2036_v9 }
 0xed7   :  { %v2758_v14 = vadd.f32 %v2757_v11, %v2397_v12 }
 0xf9e   :  { %v3102_v34 = vpop.f32.mrb[34].mxu0 }
 0xf9f   :  { %v3103_v35 = vadd.f32 %v3582_v3, %v3102_v34  ;;  %v4239_v36 = vpop.f32.mrb[35].mxu0 }
 0xfa0   :  { %v4638_v36 = vmov 3  }
 0xfa1   :  { %v3106_v37 = vsub.f32 0.0, %v3103_v35  ;;  %v4636_v35 = vmov 1  }
 0xfa3   :  { %v3107_v38 = vmul.f32 1.442695, %v3106_v37  ;;  %v4639_v37 = vmov 6  }
 0xfa5   :  { %4553 = vpow2.f32 %v3107_v38  ;;  %v4640_v38 = vmov 7  }
 0xfaf   :  { %v4554_v39 = vpop.eup %4553 }
 0xfb0   :  { %v3109_v40 = vadd.f32 1.0, %v4554_v39 }
 0xfb2   :  { %4555 = vrcp.f32 %v3109_v40 }
 0xfbc   :  { %v4556_v41 = vpop.eup %4555 }
 0xfbd   :  { %3115 = vperm.xlu0 %4513, %v4556_v41  }
0x103c   :  { %v3116_v15 = vpop.permute.xlu0 %3115 }
0x103d   :  { %v3118_v20 = vsel %vm3112_vm11, %v3116_v15, 0.0 }
0x103e   :  { %v3119_v23 = vadd.f32 %v3118_v20, %v2758_v14 }
0x1040   :  { %v3144_v25 = vmul.f32 %v5049_v49, %v3119_v23  ;;  %v3248_v27 = vmul.f32 %v3119_v23, %v4939_v44  ;;  %v3208_v30 = vmul.f32 %v5277_v58, %v3119_v23  ;;  %v3176_v32 = vmul.f32 %v5159_v59, %v3119_v23 }
0x1041   :  { %v4634_v49 = vmov 2   ;;  %v4635_v58 = vmov 4   ;;  %v4637_v59 = vmov 5   ;;  %v3240_v39 = vmul.f32 %v3587_v22, %v3119_v23 }
0x1042   :  { %v3145_v28 = vsel %vm225_vm3, %v3144_v25, 0.0  ;;  %v3249_v29 = vmul.f32 %v3248_v27, %v3239_v26  ;;  %v3209_v6 = vsel %vm225_vm3, %v3208_v30, 0.0  ;;  %v3177_v60 = vsel %vm225_vm3, %v3176_v32, 0.0  ;;  %4515 = vset.pattern.permute.xlu0 %v4634_v49 }
0x1043   :  { %3146 = vadd.xlane.f32.xlu1 %v3145_v28  ;;  %v3241_v40 = vsel %vm225_vm3, %v3240_v39, 0.0 }
0x1044   :  { %v3250_v31 = vsel %vm225_vm3, %v3249_v29, 0.0 }
0x1045   :  { %3251 = vadd.xlane.f32.xlu0 %v3250_v31 }
0x1047   :  { %3210 = vadd.xlane.f32.xlu1 %v3209_v6 }
0x1049   :  { %3178 = vadd.xlane.f32.xlu0 %v3177_v60 }
0x10d2   :  { %v3252_v44 = vpop.xlane.xlu0 %3251 }
0x10d3   :  { %v3253_v33 = vadd.f32 1e-06, %v3252_v44 }
0x10d5   :  { %4557 = vrcp.f32 %v3253_v33 }
0x10df   :  { %v4558_v3 = vpop.eup %4557 }
0x10e0   :  { %v3255_v34 = vmul.f32 %v4558_v3, %v3249_v29 }
0x10e2   :  { %3270 = vperm.xlu0 %4515, %v3255_v34   ;;  %3258 = vperm.xlu1 %4512, %v3255_v34  }
0x10e6   :  { %4517 = vset.pattern.permute.xlu0 %v4635_v58  ;;  %4514 = vset.pattern.permute.xlu1 %v4636_v35 }
0x10e7   :  { %3282 = vperm.xlu0 %4517, %v3255_v34   ;;  %3264 = vperm.xlu1 %4514, %v3255_v34  }
0x10eb   :  { %4518 = vset.pattern.permute.xlu0 %v4637_v59  ;;  %4516 = vset.pattern.permute.xlu1 %v4638_v36 }
0x10ec   :  { %3288 = vperm.xlu0 %4518, %v3255_v34   ;;  %3276 = vperm.xlu1 %4516, %v3255_v34  }
0x10f0   :  { %4519 = vset.pattern.permute.xlu0 %v4639_v37 }
0x10f1   :  { %3294 = vperm.xlu0 %4519, %v3255_v34  }
0x10f5   :  { %4520 = vset.pattern.permute.xlu0 %v4640_v38 }
0x10f6   :  { %3300 = vperm.xlu0 %4520, %v3255_v34  }
0x1110   :  { %3242 = vadd.xlane.f32.xlu1 %v3241_v40 }
0x1111   :  { %4571 = shalt.err (!%p4568_p4)
}
0x1112   :  { %s4572_s30 = scalar_lea.hbm %s5730_s14, 64 }
0x1113   :  { %p4573_p5 = scmp.ne.s32.totalorder %s5730_s14, %s4572_s30  ;;  %p4576_p6 = scmp.lt.u32.totalorder %s4572_s30, %s5730_s14 }
0x1115   :  { %p4578_p7 = pnand %p4576_p6, %p4573_p5 }
0x1117   :  { %4581 = shalt.err (!%p4578_p7)
}
0x1118   :  { %3326 = dma.vmem_to_hbm [thread:$0]  %s3324_s11, 64, %s5730_s14, [#allocation5]   ;;  %v3147_v41 = vpop.xlane.xlu1 %3146  ;;  %v3179_v43 = vpop.xlane.xlu0 %3178  ;;  %vm3305_vm3 = vcmask 257024  }
0x1119   :  { %s4642_s14 = smov [#allocation2]  }
0x111a   :  { %s3313_s0 = sshll.u32 %s4642_s14, 4  ;;  %s3314_s0 = int_to_ptr.vmem [resolvable:$true] %s3313_s0 }
0x111b   :  { %s4582_s20 = scalar_lea.vmem %s3314_s0, 64  ;;  %p4587_p9 = scmp.lt.s32.totalorder %s3314_s0, %s3314_s0 }
0x111c   :  { %v3211_v42 = vpop.xlane.xlu1 %3210  ;;  %p4583_p8 = scmp.ne.s32.totalorder %s3314_s0, %s4582_s20  ;;  %p4588_p10 = scmp.lt.s32.totalorder %s4582_s20, %s4582_s20 }
0x111e   :  { %p4589_p11 = por %p4588_p10, %p4587_p9 }
0x1120   :  { %p4590_p12 = pnand %p4589_p11, %p4583_p8 }
0x1161   :  { %v3271_v45 = vpop.permute.xlu0 %3270  ;;  %v3259_v46 = vpop.permute.xlu1 %3258 }
0x1162   :  { %v3261_v51 = vmul.f32 %v3259_v46, %v4878_v5  ;;  %v3273_v53 = vmul.f32 %v3271_v45, %v5094_v10 }
0x1166   :  { %v3283_v47 = vpop.permute.xlu0 %3282  ;;  %v3265_v48 = vpop.permute.xlu1 %3264 }
0x1167   :  { %v3267_v52 = vmul.f32 %v3265_v48, %v4982_v63  ;;  %v3285_v4 = vmul.f32 %v3283_v47, %v5324_v61 }
0x1169   :  { %v3268_v54 = vadd.f32 %v3267_v52, %v3261_v51 }
0x116b   :  { %v3289_v16 = vpop.permute.xlu0 %3288  ;;  %v3274_v55 = vadd.f32 %v3273_v53, %v3268_v54  ;;  %v3277_v56 = vpop.permute.xlu1 %3276 }
0x116c   :  { %v3279_v57 = vmul.f32 %v3277_v56, %v5204_v21  ;;  %v3291_v0 = vmul.f32 %v3289_v16, %v5432_v18 }
0x116e   :  { %v3280_v62 = vadd.f32 %v3279_v57, %v3274_v55 }
0x1170   :  { %v3286_v50 = vadd.f32 %v3285_v4, %v3280_v62  ;;  %v3295_v17 = vpop.permute.xlu0 %3294 }
0x1171   :  { %v3297_v5 = vmul.f32 %v3295_v17, %v5530_v2 }
0x1172   :  { %v3292_v7 = vadd.f32 %v3291_v0, %v3286_v50 }
0x1174   :  { %v3298_v63 = vadd.f32 %v3297_v5, %v3292_v7 }
0x1175   :  { %v3301_v8 = vpop.permute.xlu0 %3300 }
0x1176   :  { %v3303_v10 = vmul.f32 %v3301_v8, %v5607_v19 }
0x1178   :  { %v3304_v9 = vadd.f32 %v3303_v10, %v3298_v63 }
0x117a   :  { %3306 = vst.msk [vmem:[#allocation2] sm:$0xf] %vm3305_vm3, %v3304_v9 }
0x117b   :  { %4593 = shalt.err (!%p4590_p12)
}
0x117c   :  { %s4594_s9 = scalar_lea.hbm %s5729_s13, 64 }
0x117d   :  { %p4595_p13 = scmp.ne.s32.totalorder %s5729_s13, %s4594_s9  ;;  %p4598_p0 = scmp.lt.u32.totalorder %s4594_s9, %s5729_s13 }
0x117f   :  { %p4600_p1 = pnand %p4598_p0, %p4595_p13 }
0x1181   :  { %4603 = shalt.err (!%p4600_p1)
}
0x1182   :  { %3316 = dma.vmem_to_hbm [thread:$0]  %s3314_s0, 64, %s5729_s13, [#allocation3]   ;;  %v3180_v21 = vsel %vm946_vm0, %v3179_v43, 0.0  ;;  %v3148_v61 = vsel %vm585_vm1, %v3147_v41, 0.0  ;;  %v3212_v2 = vsel %vm1307_vm2, %v3211_v42, 0.0  ;;  %vm3246_vm12 = vcmask 27648  }
0x1183   :  { %v3181_v18 = vadd.f32 %v3180_v21, %v3148_v61  ;;  %s4643_s25 = smov [#allocation6]  }
0x1184   :  { %s3333_s26 = sshll.u32 %s4643_s25, 4  ;;  %s3334_s26 = int_to_ptr.vmem [resolvable:$true] %s3333_s26 }
0x1185   :  { %v3213_v19 = vadd.f32 %v3212_v2, %v3181_v18  ;;  %s4604_s13 = scalar_lea.vmem %s3334_s26, 64  ;;  %p4609_p3 = scmp.lt.s32.totalorder %s3334_s26, %s3334_s26 }
0x1186   :  { %p4605_p2 = scmp.ne.s32.totalorder %s3334_s26, %s4604_s13  ;;  %p4610_p4 = scmp.lt.s32.totalorder %s4604_s13, %s4604_s13 }
0x1188   :  { %p4611_p5 = por %p4610_p4, %p4609_p3 }
0x118a   :  { %p4612_p6 = pnand %p4611_p5, %p4605_p2 }
0x119d   :  { %v3243_v11 = vpop.xlane.xlu1 %3242 }
0x119e   :  { %v3244_v12 = vsel %vm1668_vm6, %v3243_v11, 0.0 }
0x119f   :  { %v3245_v13 = vadd.f32 %v3244_v12, %v3213_v19 }
0x11a1   :  { %3247 = vst.msk [vmem:[#allocation6] sm:$0xf] %vm3246_vm12, %v3245_v13 }
0x11a2   :  { %4615 = shalt.err (!%p4612_p6)
}
0x11a3   :  { %s4616_s29 = scalar_lea.hbm %s5731_s15, 64 }
0x11a4   :  { %p4617_p7 = scmp.ne.s32.totalorder %s5731_s15, %s4616_s29  ;;  %p4620_p8 = scmp.lt.u32.totalorder %s4616_s29, %s5731_s15 }
0x11a6   :  { %p4622_p9 = pnand %p4620_p8, %p4617_p7 }
0x11a8   :  { %4625 = shalt.err (!%p4622_p9)
}
0x11a9   :  { %3336 = dma.vmem_to_hbm [thread:$0]  %s3334_s26, 64, %s5731_s15, [#allocation5]  }
0x11aa   :  { %4626 = dma.done.wait [#allocation3], 64  }
0x11ab   :  { %4627 = vsyncadd [#allocation3], 4294967232 }
0x11ac   :  { %4628 = dma.done.wait [#allocation5], 128  }
0x11ad   :  { %4629 = vsyncadd [#allocation5], 4294967168 }
0x11ae   :  { %3346 = vsyncpa [#allocation3], 1 }
0x11af   :  { %3347 = vsyncpa [#allocation5], 1 }

</bundles_post_ra>
